<compile_context>
chip_gen: v5e
topology: v5e:2x2
jax: 0.10.0
libtpu: 0.0.40
codegen_flags: <defaults>
</compile_context>

<pallas_src>
import jax
import jax.numpy as jnp
from jax import lax
from jax.experimental import pallas as pl
from jax.experimental.pallas import tpu as pltpu

# ----------------------------- config ---------------------------------------
B = 2          # batch
T = 8          # sequence length (padded "longest")
H = 128        # hidden size
NH = 4         # attention heads
DH = H // NH   # head dim
FFN = 256      # feed-forward width
VOCAB = 512
LAYERS = 2
LN_EPS = 1e-12

# MXU operand dtype: bf16 doubles matmul throughput on v6e/v7x; elementwise
# math stays f32 (v5e VPU/EUP have no bf16 path).
MXU_DTYPE = jnp.bfloat16

# Row layout of the packed per-layer "misc" slab [LAYERS, 8, 3H]:
#   0: bqkv (3H)   1: b1 (FFN)   2: bo (H)   3: b2 (H)
#   4: ln1 gamma   5: ln1 beta   6: ln2 gamma 7: ln2 beta


# --------------------------- Pallas kernel -----------------------------------
def _layernorm(x, gamma, beta):
    mu = jnp.mean(x, axis=-1, keepdims=True)
    var = jnp.mean((x - mu) ** 2, axis=-1, keepdims=True)
    return (x - mu) * lax.rsqrt(var + LN_EPS) * gamma + beta


def _encoder_kernel(eos_ref,                       # SMEM [B] (scalar prefetch)
                    x0_ref, bias_ref, embln_ref,
                    wqkv_ref, wo_ref, w1_ref, w2_ref, misc_ref,
                    out_ref,                        # [B, H] pooled embedding
                    x_sc, a_sc):                    # VMEM carries
    """One transformer layer per grid step; activation carried in VMEM scratch.
    Final grid step also does eos pooling + unit-ball normalization."""
    l = pl.program_id(0)

    @pl.when(l == 0)
    def _():
        # Embedding LayerNorm fused into the first grid step.
        emb_ln = embln_ref[...]                                   # [2, H]
        x_sc[...] = _layernorm(x0_ref[...], emb_ln[0:1, :], emb_ln[1:2, :])

    x = x_sc[...]                                                 # [B*T, H] f32

    # Per-layer small params: one slab load, then cheap static slices.
    misc = misc_ref[...]                                          # [8, 3H]
    bqkv = misc[0:1, :]                                           # [1, 3H]
    b1 = misc[1:2, :FFN]
    bo = misc[2:3, :H]
    b2 = misc[3:4, :H]
    ln1_g, ln1_b = misc[4:5, :H], misc[5:6, :H]
    ln2_g, ln2_b = misc[6:7, :H], misc[7:8, :H]

    # ---- fused QKV projection: one [B*T, H] @ [H, 3H] MXU op ----------------
    # 1/sqrt(DH) is pre-folded into the Q columns of wqkv (and bqkv) at init.
    qkv = jnp.dot(x.astype(MXU_DTYPE), wqkv_ref[...],
                  preferred_element_type=jnp.float32) + bqkv      # [B*T, 3H]

    # ---- multi-head attention, heads written straight into a_sc -------------
    bias = bias_ref[...]                                          # [B, T] additive
    for b in range(B):                                            # static unroll
        r0 = b * T
        # Hoisted: one key-bias broadcast per batch (not per head).
        bias_bt = jnp.broadcast_to(bias[b:b + 1, :], (T, T))      # [T, T]
        for h in range(NH):                                       # static unroll
            c0 = h * DH
            q = qkv[r0:r0 + T, c0:c0 + DH]                        # [T, DH]
            k = qkv[r0:r0 + T, H + c0:H + c0 + DH]                # [T, DH]
            v = qkv[r0:r0 + T, 2 * H + c0:2 * H + c0 + DH]        # [T, DH]
            s = lax.dot_general(q.astype(MXU_DTYPE), k.astype(MXU_DTYPE),
                                (((1,), (1,)), ((), ())),
                                preferred_element_type=jnp.float32)
            s = s + bias_bt                                       # mask keys
            m = jnp.max(s, axis=-1, keepdims=True)
            p = jnp.exp(s - m)
            p = p * pl.reciprocal(jnp.sum(p, axis=-1, keepdims=True), approx=True)
            # Direct slice store (no concatenates / extra copies).
            a_sc[r0:r0 + T, c0:c0 + DH] = jnp.dot(
                p.astype(MXU_DTYPE), v.astype(MXU_DTYPE),
                preferred_element_type=jnp.float32)

    # ---- out-proj + residual + LayerNorm (fused) -----------------------------
    ao = jnp.dot(a_sc[...].astype(MXU_DTYPE), wo_ref[...],
                 preferred_element_type=jnp.float32) + bo
    x1 = _layernorm(ao + x, ln1_g, ln1_b)

    # ---- FFN (gelu) + residual + LayerNorm (fused; [B*T, FFN] stays in VMEM) -
    ff = jnp.dot(x1.astype(MXU_DTYPE), w1_ref[...],
                 preferred_element_type=jnp.float32) + b1
    # TODO(synk): BERT uses erf-based GELU; tanh approximation kept (EUP path).
    ff = jax.nn.gelu(ff, approximate=True)
    y = jnp.dot(ff.astype(MXU_DTYPE), w2_ref[...],
                preferred_element_type=jnp.float32) + b2
    x2 = _layernorm(y + x1, ln2_g, ln2_b)

    x_sc[...] = x2                                 # layer carry (no out_ref copy)

    # ---- fused pool_and_normalize on the final layer step --------------------
    @pl.when(l == pl.num_programs(0) - 1)
    def _():
        for b in range(B):                                        # static unroll
            sel = (lax.broadcasted_iota(jnp.int32, (T, 1), 0)
                   == eos_ref[b]).astype(jnp.float32)             # [T, 1]
            out_ref[b:b + 1, :] = jnp.sum(x2[b * T:b * T + T, :] * sel,
                                          axis=0, keepdims=True)  # [1, H]
        mu = out_ref[...]                                         # [B, H]
        norm = jnp.sqrt(jnp.sum(mu * mu, axis=-1, keepdims=True))
        factor = jnp.where(norm > 1.0, norm, jnp.ones_like(norm))
        out_ref[...] = mu / factor


def star_encoder_core(x0, bias, eos_idx, p):
    """x0: [B*T, H] f32, bias: [B, T] f32 additive key bias,
    eos_idx: [B] int32 -> pooled/normalized [B, H] f32."""
    grid_spec = pltpu.PrefetchScalarGridSpec(
        num_scalar_prefetch=1,                     # eos_idx -> SMEM
        grid=(LAYERS,),
        in_specs=[
            pl.BlockSpec((B * T, H), lambda l, eos: (0, 0)),        # x0
            pl.BlockSpec((B, T), lambda l, eos: (0, 0)),            # attn bias
            pl.BlockSpec((2, H), lambda l, eos: (0, 0)),            # emb LN
            pl.BlockSpec((None, H, 3 * H), lambda l, eos: (l, 0, 0)),  # wqkv
            pl.BlockSpec((None, H, H), lambda l, eos: (l, 0, 0)),      # wo
            pl.BlockSpec((None, H, FFN), lambda l, eos: (l, 0, 0)),    # w1
            pl.BlockSpec((None, FFN, H), lambda l, eos: (l, 0, 0)),    # w2
            pl.BlockSpec((None, 8, 3 * H), lambda l, eos: (l, 0, 0)),  # misc slab
        ],
        out_specs=pl.BlockSpec((B, H), lambda l, eos: (0, 0)),
        scratch_shapes=[pltpu.VMEM((B * T, H), jnp.float32),        # activation carry
                        pltpu.VMEM((B * T, H), jnp.float32)],       # attn output
    )
    # NOTE(scale-up): with real StarEncoder sizes (H=768, FFN=3072, 12 layers),
    # re-derive VMEM (v7x has 64 MiB) and set vmem_limit_bytes / tile w1,w2.
    return pl.pallas_call(
        _encoder_kernel,
        out_shape=jax.ShapeDtypeStruct((B, H), jnp.float32),
        grid_spec=grid_spec,
        compiler_params=pltpu.CompilerParams(
            dimension_semantics=("arbitrary",)),   # sequential layer carry
    )(eos_idx, x0, bias, p["emb_ln"], p["wqkv"], p["wo"], p["w1"], p["w2"],
      p["misc"])


# ---------------------- encoder glue (plain JAX) -----------------------------
def init_params(key):
    def w(k, shape, scale=0.02):
        return scale * jax.random.normal(k, shape, dtype=jnp.float32)

    keys = jax.random.split(key, 6)
    ones = jnp.ones((H,), jnp.float32)
    zeros = jnp.zeros((H,), jnp.float32)
    emb_ln = jnp.stack([ones, zeros])                             # [2, H]

    # Fold the 1/sqrt(DH) attention scale into the Q projection at init.
    attn_scale = 1.0 / (DH ** 0.5)
    wqkv = w(keys[2], (LAYERS, H, 3 * H))
    wqkv = wqkv.at[:, :, :H].multiply(attn_scale)
    bqkv = jnp.zeros((LAYERS, 3 * H), jnp.float32)
    bqkv = bqkv.at[:, :H].multiply(attn_scale)                    # no-op (zeros)

    # Pack all small per-layer params into one [LAYERS, 8, 3H] slab
    # -> a single small DMA per grid step instead of ~7.
    misc = jnp.zeros((LAYERS, 8, 3 * H), jnp.float32)
    misc = misc.at[:, 0, :].set(bqkv)                                  # bqkv
    misc = misc.at[:, 1, :FFN].set(jnp.zeros((LAYERS, FFN)))           # b1
    misc = misc.at[:, 2, :H].set(jnp.zeros((LAYERS, H)))               # bo
    misc = misc.at[:, 3, :H].set(jnp.zeros((LAYERS, H)))               # b2
    misc = misc.at[:, 4, :H].set(jnp.broadcast_to(ones, (LAYERS, H)))  # ln1 g
    misc = misc.at[:, 5, :H].set(jnp.broadcast_to(zeros, (LAYERS, H))) # ln1 b
    misc = misc.at[:, 6, :H].set(jnp.broadcast_to(ones, (LAYERS, H)))  # ln2 g
    misc = misc.at[:, 7, :H].set(jnp.broadcast_to(zeros, (LAYERS, H))) # ln2 b

    return {
        "word_emb": w(keys[0], (VOCAB, H)),
        "pos_emb": w(keys[1], (T, H)),
        "emb_ln": emb_ln,
        # Per-layer MXU matrices stacked on a leading LAYERS axis, bf16.
        "wqkv": wqkv.astype(MXU_DTYPE),
        "wo": w(keys[3], (LAYERS, H, H)).astype(MXU_DTYPE),
        "w1": w(keys[4], (LAYERS, H, FFN)).astype(MXU_DTYPE),
        "w2": w(keys[5], (LAYERS, FFN, H)).astype(MXU_DTYPE),
        "misc": misc,
    }


def star_encoder_forward(params, token_ids, attention_mask):
    """token_ids: [B, T] int32, attention_mask: [B, T] int32 -> [B, H] f32."""
    # Embedding gather + position add stays in JAX glue (no Pallas win at B*T=16).
    emb = params["word_emb"][token_ids] + params["pos_emb"][None, :, :]
    x0 = emb.reshape(B * T, H).astype(jnp.float32)
    # Additive attention key bias and eos indices precomputed once in glue.
    bias = (1.0 - attention_mask.astype(jnp.float32)) * -1e9      # [B, T]
    eos_idx = jnp.sum(attention_mask, axis=1).astype(jnp.int32) - 1   # [B]
    return star_encoder_core(x0, bias, eos_idx, params)


# ------------------------------- main ----------------------------------------
if __name__ == "__main__":
    key = jax.random.PRNGKey(0)
    pkey, tkey = jax.random.split(key)
    params = init_params(pkey)

    # Deterministic synthetic "tokenized" batch: padded to length T, with
    # per-example lengths (CLS ... SEP then PAD).
    token_ids = jax.random.randint(tkey, (B, T), 0, VOCAB, dtype=jnp.int32)
    lengths = jnp.array([T, 5], dtype=jnp.int32)
    attention_mask = (jnp.arange(T, dtype=jnp.int32)[None, :]
                      < lengths[:, None]).astype(jnp.int32)

    fwd = jax.jit(star_encoder_forward)
    embedding = fwd(params, token_ids, attention_mask)
    jax.block_until_ready(embedding)

    assert embedding.shape == (B, H) and embedding.dtype == jnp.float32
    assert bool(jnp.all(jnp.isfinite(embedding)))
    # Pooled embeddings must lie inside the unit ball (norm > 1 gets normalized).
    norms = jnp.linalg.norm(embedding, axis=1)
    assert bool(jnp.all(norms <= 1.0 + 1e-5))
    print("KERNEL_OK")
</pallas_src>

<mosaic_0001>
module attributes {stable_mosaic.version = 11 : i64} {
  func.func @_encoder_kernel(%arg0: i32, %arg1: memref<2xi32, #tpu.memory_space<smem>>, %arg2: memref<16x128xf32, #tpu.memory_space<vmem>>, %arg3: memref<2x8xf32, #tpu.memory_space<vmem>>, %arg4: memref<2x128xf32, #tpu.memory_space<vmem>>, %arg5: memref<1x128x384xbf16, #tpu.memory_space<vmem>>, %arg6: memref<1x128x128xbf16, #tpu.memory_space<vmem>>, %arg7: memref<1x128x256xbf16, #tpu.memory_space<vmem>>, %arg8: memref<1x256x128xbf16, #tpu.memory_space<vmem>>, %arg9: memref<1x8x384xf32, #tpu.memory_space<vmem>>, %arg10: memref<2x128xf32, #tpu.memory_space<vmem>>, %arg11: memref<16x128xf32, #tpu.memory_space<vmem>>, %arg12: memref<16x128xf32, #tpu.memory_space<vmem>>) attributes {dimension_semantics = [#tpu.dimension_semantics<arbitrary>], iteration_bounds = array<i64: 2>, scalar_prefetch = 1 : i64, scratch_operands = 2 : i64, tpu.core_type = #tpu.core_type<tc>, window_params = [{pipeline_mode = #tpu.pipeline_mode<synchronous>, transform_indices = @transform_0, window_bounds = array<i64: 16, 128>}, {pipeline_mode = #tpu.pipeline_mode<synchronous>, transform_indices = @transform_1, window_bounds = array<i64: 2, 8>}, {pipeline_mode = #tpu.pipeline_mode<synchronous>, transform_indices = @transform_2, window_bounds = array<i64: 2, 128>}, {transform_indices = @transform_3, window_bounds = array<i64: 1, 128, 384>}, {transform_indices = @transform_4, window_bounds = array<i64: 1, 128, 128>}, {transform_indices = @transform_5, window_bounds = array<i64: 1, 128, 256>}, {transform_indices = @transform_6, window_bounds = array<i64: 1, 256, 128>}, {transform_indices = @transform_7, window_bounds = array<i64: 1, 8, 384>}, {pipeline_mode = #tpu.pipeline_mode<synchronous>, transform_indices = @transform_8, window_bounds = array<i64: 2, 128>}]} {
    %c0_i32 = arith.constant 0 : i32
    %0 = arith.cmpi eq, %arg0, %c0_i32 : i32
    %1 = arith.extui %0 : i1 to i32
    %c0_i32_0 = arith.constant 0 : i32
    %2 = arith.cmpi ne, %1, %c0_i32_0 : i32
    scf.if %2 {
      %c0_85 = arith.constant 0 : index
      %c0_86 = arith.constant 0 : index
      %277 = vector.load %arg4[%c0_85, %c0_86] : memref<2x128xf32, #tpu.memory_space<vmem>>, vector<2x128xf32>
      %c0_87 = arith.constant 0 : index
      %c0_88 = arith.constant 0 : index
      %278 = vector.load %arg2[%c0_87, %c0_88] : memref<16x128xf32, #tpu.memory_space<vmem>>, vector<16x128xf32>
      %279 = vector.extract_strided_slice %277 {offsets = [0, 0], sizes = [1, 128], strides = [1, 1]} : vector<2x128xf32> to vector<1x128xf32>
      %280 = vector.extract_strided_slice %277 {offsets = [1, 0], sizes = [1, 128], strides = [1, 1]} : vector<2x128xf32> to vector<1x128xf32>
      %cst_89 = arith.constant dense<0.000000e+00> : vector<16xf32>
      %281 = vector.multi_reduction <add>, %278, %cst_89 [1] : vector<16x128xf32> to vector<16xf32>
      %282 = vector.shape_cast %281 : vector<16xf32> to vector<16x1xf32>
      %cst_90 = arith.constant 1.280000e+02 : f32
      %283 = vector.broadcast %cst_90 : f32 to vector<16x1xf32>
      %284 = arith.divf %282, %283 : vector<16x1xf32>
      %285 = vector.broadcast %284 : vector<16x1xf32> to vector<16x128xf32>
      %286 = arith.subf %278, %285 : vector<16x128xf32>
      %287 = arith.mulf %286, %286 : vector<16x128xf32>
      %cst_91 = arith.constant dense<0.000000e+00> : vector<16xf32>
      %288 = vector.multi_reduction <add>, %287, %cst_91 [1] : vector<16x128xf32> to vector<16xf32>
      %289 = vector.shape_cast %288 : vector<16xf32> to vector<16x1xf32>
      %cst_92 = arith.constant 1.280000e+02 : f32
      %290 = vector.broadcast %cst_92 : f32 to vector<16x1xf32>
      %291 = arith.divf %289, %290 : vector<16x1xf32>
      %292 = vector.broadcast %284 : vector<16x1xf32> to vector<16x128xf32>
      %293 = arith.subf %278, %292 : vector<16x128xf32>
      %cst_93 = arith.constant 9.99999996E-13 : f32
      %294 = vector.broadcast %cst_93 : f32 to vector<16x1xf32>
      %295 = arith.addf %291, %294 : vector<16x1xf32>
      %296 = math.rsqrt %295 : vector<16x1xf32>
      %297 = vector.broadcast %296 : vector<16x1xf32> to vector<16x128xf32>
      %298 = arith.mulf %293, %297 : vector<16x128xf32>
      %299 = vector.broadcast %279 : vector<1x128xf32> to vector<16x128xf32>
      %300 = arith.mulf %298, %299 : vector<16x128xf32>
      %301 = vector.broadcast %280 : vector<1x128xf32> to vector<16x128xf32>
      %302 = arith.addf %300, %301 : vector<16x128xf32>
      %c0_94 = arith.constant 0 : index
      %c0_95 = arith.constant 0 : index
      %303 = vector.load %arg11[%c0_94, %c0_95] : memref<16x128xf32, #tpu.memory_space<vmem>>, vector<16x128xf32>
      tpu.vector_store %arg11[%c0_94, %c0_95], %302 {strides = array<i32>} : memref<16x128xf32, #tpu.memory_space<vmem>>, vector<16x128xf32>,
    } else {
    }
    %c0 = arith.constant 0 : index
    %c0_1 = arith.constant 0 : index
    %3 = vector.load %arg11[%c0, %c0_1] : memref<16x128xf32, #tpu.memory_space<vmem>>, vector<16x128xf32>
    %c0_2 = arith.constant 0 : index
    %c0_3 = arith.constant 0 : index
    %c0_4 = arith.constant 0 : index
    %4 = vector.load %arg9[%c0_2, %c0_3, %c0_4] : memref<1x8x384xf32, #tpu.memory_space<vmem>>, vector<1x8x384xf32>
    %5 = vector.shape_cast %4 : vector<1x8x384xf32> to vector<8x384xf32>
    %6 = vector.extract_strided_slice %5 {offsets = [0, 0], sizes = [1, 384], strides = [1, 1]} : vector<8x384xf32> to vector<1x384xf32>
    %7 = vector.extract_strided_slice %5 {offsets = [1, 0], sizes = [1, 256], strides = [1, 1]} : vector<8x384xf32> to vector<1x256xf32>
    %8 = vector.extract_strided_slice %5 {offsets = [2, 0], sizes = [1, 128], strides = [1, 1]} : vector<8x384xf32> to vector<1x128xf32>
    %9 = vector.extract_strided_slice %5 {offsets = [3, 0], sizes = [1, 128], strides = [1, 1]} : vector<8x384xf32> to vector<1x128xf32>
    %10 = vector.extract_strided_slice %5 {offsets = [4, 0], sizes = [1, 128], strides = [1, 1]} : vector<8x384xf32> to vector<1x128xf32>
    %11 = vector.extract_strided_slice %5 {offsets = [5, 0], sizes = [1, 128], strides = [1, 1]} : vector<8x384xf32> to vector<1x128xf32>
    %12 = vector.extract_strided_slice %5 {offsets = [6, 0], sizes = [1, 128], strides = [1, 1]} : vector<8x384xf32> to vector<1x128xf32>
    %13 = vector.extract_strided_slice %5 {offsets = [7, 0], sizes = [1, 128], strides = [1, 1]} : vector<8x384xf32> to vector<1x128xf32>
    %14 = arith.truncf %3 : vector<16x128xf32> to vector<16x128xbf16>
    %c0_5 = arith.constant 0 : index
    %c0_6 = arith.constant 0 : index
    %c0_7 = arith.constant 0 : index
    %15 = vector.load %arg5[%c0_5, %c0_6, %c0_7] : memref<1x128x384xbf16, #tpu.memory_space<vmem>>, vector<1x128x384xbf16>
    %16 = vector.shape_cast %15 : vector<1x128x384xbf16> to vector<128x384xbf16>
    %cst = arith.constant dense<0.000000e+00> : vector<16x384xf32>
    %17 = tpu.matmul %14, %16, %cst {dimension_numbers = #tpu.dot_dimension_numbers<[1], [0], [0], [1], [0, 0, 1, 1], [], []>} : vector<16x128xbf16>, vector<128x384xbf16>, vector<16x384xf32> -> vector<16x384xf32>
    %18 = vector.broadcast %6 : vector<1x384xf32> to vector<16x384xf32>
    %19 = arith.addf %17, %18 : vector<16x384xf32>
    %c0_8 = arith.constant 0 : index
    %c0_9 = arith.constant 0 : index
    %20 = vector.load %arg3[%c0_8, %c0_9] : memref<2x8xf32, #tpu.memory_space<vmem>>, vector<2x8xf32>
    %21 = vector.extract_strided_slice %20 {offsets = [0, 0], sizes = [1, 8], strides = [1, 1]} : vector<2x8xf32> to vector<1x8xf32>
    %22 = vector.shape_cast %21 : vector<1x8xf32> to vector<1x8xf32>
    %23 = vector.broadcast %22 : vector<1x8xf32> to vector<8x8xf32>
    %24 = vector.extract_strided_slice %19 {offsets = [0, 0], sizes = [8, 32], strides = [1, 1]} : vector<16x384xf32> to vector<8x32xf32>
    %25 = vector.extract_strided_slice %19 {offsets = [0, 128], sizes = [8, 32], strides = [1, 1]} : vector<16x384xf32> to vector<8x32xf32>
    %26 = vector.extract_strided_slice %19 {offsets = [0, 256], sizes = [8, 32], strides = [1, 1]} : vector<16x384xf32> to vector<8x32xf32>
    %27 = arith.truncf %24 : vector<8x32xf32> to vector<8x32xbf16>
    %28 = arith.truncf %25 : vector<8x32xf32> to vector<8x32xbf16>
    %cst_10 = arith.constant dense<0.000000e+00> : vector<8x8xf32>
    %29 = tpu.matmul %27, %28, %cst_10 {dimension_numbers = #tpu.dot_dimension_numbers<[1], [1], [0], [0], [0, 0, 1, 0], [], []>} : vector<8x32xbf16>, vector<8x32xbf16>, vector<8x8xf32> -> vector<8x8xf32>
    %30 = arith.addf %29, %23 : vector<8x8xf32>
    %cst_11 = arith.constant dense<0xFF800000> : vector<8xf32>
    %31 = vector.multi_reduction <maximumf>, %30, %cst_11 [1] : vector<8x8xf32> to vector<8xf32>
    %32 = vector.shape_cast %31 : vector<8xf32> to vector<8x1xf32>
    %33 = vector.broadcast %32 : vector<8x1xf32> to vector<8x8xf32>
    %34 = arith.subf %30, %33 : vector<8x8xf32>
    %35 = math.exp %34 : vector<8x8xf32>
    %cst_12 = arith.constant dense<0.000000e+00> : vector<8xf32>
    %36 = vector.multi_reduction <add>, %35, %cst_12 [1] : vector<8x8xf32> to vector<8xf32>
    %37 = vector.shape_cast %36 : vector<8xf32> to vector<8x1xf32>
    %38 = tpu.reciprocal %37 {approx = true} : vector<8x1xf32> -> vector<8x1xf32>
    %39 = vector.broadcast %38 : vector<8x1xf32> to vector<8x8xf32>
    %40 = arith.mulf %35, %39 : vector<8x8xf32>
    %41 = arith.truncf %40 : vector<8x8xf32> to vector<8x8xbf16>
    %42 = arith.truncf %26 : vector<8x32xf32> to vector<8x32xbf16>
    %cst_13 = arith.constant dense<0.000000e+00> : vector<8x32xf32>
    %43 = tpu.matmul %41, %42, %cst_13 {dimension_numbers = #tpu.dot_dimension_numbers<[1], [0], [0], [1], [0, 0, 1, 1], [], []>} : vector<8x8xbf16>, vector<8x32xbf16>, vector<8x32xf32> -> vector<8x32xf32>
    %c0_14 = arith.constant 0 : index
    %c0_15 = arith.constant 0 : index
    %44 = vector.load %arg12[%c0_14, %c0_15] : memref<16x128xf32, #tpu.memory_space<vmem>>, vector<8x32xf32>
    tpu.vector_store %arg12[%c0_14, %c0_15], %43 {strides = array<i32>} : memref<16x128xf32, #tpu.memory_space<vmem>>, vector<8x32xf32>,
    %45 = vector.extract_strided_slice %19 {offsets = [0, 32], sizes = [8, 32], strides = [1, 1]} : vector<16x384xf32> to vector<8x32xf32>
    %46 = vector.extract_strided_slice %19 {offsets = [0, 160], sizes = [8, 32], strides = [1, 1]} : vector<16x384xf32> to vector<8x32xf32>
    %47 = vector.extract_strided_slice %19 {offsets = [0, 288], sizes = [8, 32], strides = [1, 1]} : vector<16x384xf32> to vector<8x32xf32>
    %48 = arith.truncf %45 : vector<8x32xf32> to vector<8x32xbf16>
    %49 = arith.truncf %46 : vector<8x32xf32> to vector<8x32xbf16>
    %cst_16 = arith.constant dense<0.000000e+00> : vector<8x8xf32>
    %50 = tpu.matmul %48, %49, %cst_16 {dimension_numbers = #tpu.dot_dimension_numbers<[1], [1], [0], [0], [0, 0, 1, 0], [], []>} : vector<8x32xbf16>, vector<8x32xbf16>, vector<8x8xf32> -> vector<8x8xf32>
    %51 = arith.addf %50, %23 : vector<8x8xf32>
    %cst_17 = arith.constant dense<0xFF800000> : vector<8xf32>
    %52 = vector.multi_reduction <maximumf>, %51, %cst_17 [1] : vector<8x8xf32> to vector<8xf32>
    %53 = vector.shape_cast %52 : vector<8xf32> to vector<8x1xf32>
    %54 = vector.broadcast %53 : vector<8x1xf32> to vector<8x8xf32>
    %55 = arith.subf %51, %54 : vector<8x8xf32>
    %56 = math.exp %55 : vector<8x8xf32>
    %cst_18 = arith.constant dense<0.000000e+00> : vector<8xf32>
    %57 = vector.multi_reduction <add>, %56, %cst_18 [1] : vector<8x8xf32> to vector<8xf32>
    %58 = vector.shape_cast %57 : vector<8xf32> to vector<8x1xf32>
    %59 = tpu.reciprocal %58 {approx = true} : vector<8x1xf32> -> vector<8x1xf32>
    %60 = vector.broadcast %59 : vector<8x1xf32> to vector<8x8xf32>
    %61 = arith.mulf %56, %60 : vector<8x8xf32>
    %62 = arith.truncf %61 : vector<8x8xf32> to vector<8x8xbf16>
    %63 = arith.truncf %47 : vector<8x32xf32> to vector<8x32xbf16>
    %cst_19 = arith.constant dense<0.000000e+00> : vector<8x32xf32>
    %64 = tpu.matmul %62, %63, %cst_19 {dimension_numbers = #tpu.dot_dimension_numbers<[1], [0], [0], [1], [0, 0, 1, 1], [], []>} : vector<8x8xbf16>, vector<8x32xbf16>, vector<8x32xf32> -> vector<8x32xf32>
    %c0_20 = arith.constant 0 : index
    %c32 = arith.constant 32 : index
    %65 = vector.load %arg12[%c0_20, %c32] : memref<16x128xf32, #tpu.memory_space<vmem>>, vector<8x32xf32>
    tpu.vector_store %arg12[%c0_20, %c32], %64 {strides = array<i32>} : memref<16x128xf32, #tpu.memory_space<vmem>>, vector<8x32xf32>,
    %66 = vector.extract_strided_slice %19 {offsets = [0, 64], sizes = [8, 32], strides = [1, 1]} : vector<16x384xf32> to vector<8x32xf32>
    %67 = vector.extract_strided_slice %19 {offsets = [0, 192], sizes = [8, 32], strides = [1, 1]} : vector<16x384xf32> to vector<8x32xf32>
    %68 = vector.extract_strided_slice %19 {offsets = [0, 320], sizes = [8, 32], strides = [1, 1]} : vector<16x384xf32> to vector<8x32xf32>
    %69 = arith.truncf %66 : vector<8x32xf32> to vector<8x32xbf16>
    %70 = arith.truncf %67 : vector<8x32xf32> to vector<8x32xbf16>
    %cst_21 = arith.constant dense<0.000000e+00> : vector<8x8xf32>
    %71 = tpu.matmul %69, %70, %cst_21 {dimension_numbers = #tpu.dot_dimension_numbers<[1], [1], [0], [0], [0, 0, 1, 0], [], []>} : vector<8x32xbf16>, vector<8x32xbf16>, vector<8x8xf32> -> vector<8x8xf32>
    %72 = arith.addf %71, %23 : vector<8x8xf32>
    %cst_22 = arith.constant dense<0xFF800000> : vector<8xf32>
    %73 = vector.multi_reduction <maximumf>, %72, %cst_22 [1] : vector<8x8xf32> to vector<8xf32>
    %74 = vector.shape_cast %73 : vector<8xf32> to vector<8x1xf32>
    %75 = vector.broadcast %74 : vector<8x1xf32> to vector<8x8xf32>
    %76 = arith.subf %72, %75 : vector<8x8xf32>
    %77 = math.exp %76 : vector<8x8xf32>
    %cst_23 = arith.constant dense<0.000000e+00> : vector<8xf32>
    %78 = vector.multi_reduction <add>, %77, %cst_23 [1] : vector<8x8xf32> to vector<8xf32>
    %79 = vector.shape_cast %78 : vector<8xf32> to vector<8x1xf32>
    %80 = tpu.reciprocal %79 {approx = true} : vector<8x1xf32> -> vector<8x1xf32>
    %81 = vector.broadcast %80 : vector<8x1xf32> to vector<8x8xf32>
    %82 = arith.mulf %77, %81 : vector<8x8xf32>
    %83 = arith.truncf %82 : vector<8x8xf32> to vector<8x8xbf16>
    %84 = arith.truncf %68 : vector<8x32xf32> to vector<8x32xbf16>
    %cst_24 = arith.constant dense<0.000000e+00> : vector<8x32xf32>
    %85 = tpu.matmul %83, %84, %cst_24 {dimension_numbers = #tpu.dot_dimension_numbers<[1], [0], [0], [1], [0, 0, 1, 1], [], []>} : vector<8x8xbf16>, vector<8x32xbf16>, vector<8x32xf32> -> vector<8x32xf32>
    %c0_25 = arith.constant 0 : index
    %c64 = arith.constant 64 : index
    %86 = vector.load %arg12[%c0_25, %c64] : memref<16x128xf32, #tpu.memory_space<vmem>>, vector<8x32xf32>
    tpu.vector_store %arg12[%c0_25, %c64], %85 {strides = array<i32>} : memref<16x128xf32, #tpu.memory_space<vmem>>, vector<8x32xf32>,
    %87 = vector.extract_strided_slice %19 {offsets = [0, 96], sizes = [8, 32], strides = [1, 1]} : vector<16x384xf32> to vector<8x32xf32>
    %88 = vector.extract_strided_slice %19 {offsets = [0, 224], sizes = [8, 32], strides = [1, 1]} : vector<16x384xf32> to vector<8x32xf32>
    %89 = vector.extract_strided_slice %19 {offsets = [0, 352], sizes = [8, 32], strides = [1, 1]} : vector<16x384xf32> to vector<8x32xf32>
    %90 = arith.truncf %87 : vector<8x32xf32> to vector<8x32xbf16>
    %91 = arith.truncf %88 : vector<8x32xf32> to vector<8x32xbf16>
    %cst_26 = arith.constant dense<0.000000e+00> : vector<8x8xf32>
    %92 = tpu.matmul %90, %91, %cst_26 {dimension_numbers = #tpu.dot_dimension_numbers<[1], [1], [0], [0], [0, 0, 1, 0], [], []>} : vector<8x32xbf16>, vector<8x32xbf16>, vector<8x8xf32> -> vector<8x8xf32>
    %93 = arith.addf %92, %23 : vector<8x8xf32>
    %cst_27 = arith.constant dense<0xFF800000> : vector<8xf32>
    %94 = vector.multi_reduction <maximumf>, %93, %cst_27 [1] : vector<8x8xf32> to vector<8xf32>
    %95 = vector.shape_cast %94 : vector<8xf32> to vector<8x1xf32>
    %96 = vector.broadcast %95 : vector<8x1xf32> to vector<8x8xf32>
    %97 = arith.subf %93, %96 : vector<8x8xf32>
    %98 = math.exp %97 : vector<8x8xf32>
    %cst_28 = arith.constant dense<0.000000e+00> : vector<8xf32>
    %99 = vector.multi_reduction <add>, %98, %cst_28 [1] : vector<8x8xf32> to vector<8xf32>
    %100 = vector.shape_cast %99 : vector<8xf32> to vector<8x1xf32>
    %101 = tpu.reciprocal %100 {approx = true} : vector<8x1xf32> -> vector<8x1xf32>
    %102 = vector.broadcast %101 : vector<8x1xf32> to vector<8x8xf32>
    %103 = arith.mulf %98, %102 : vector<8x8xf32>
    %104 = arith.truncf %103 : vector<8x8xf32> to vector<8x8xbf16>
    %105 = arith.truncf %89 : vector<8x32xf32> to vector<8x32xbf16>
    %cst_29 = arith.constant dense<0.000000e+00> : vector<8x32xf32>
    %106 = tpu.matmul %104, %105, %cst_29 {dimension_numbers = #tpu.dot_dimension_numbers<[1], [0], [0], [1], [0, 0, 1, 1], [], []>} : vector<8x8xbf16>, vector<8x32xbf16>, vector<8x32xf32> -> vector<8x32xf32>
    %c0_30 = arith.constant 0 : index
    %c96 = arith.constant 96 : index
    %107 = vector.load %arg12[%c0_30, %c96] : memref<16x128xf32, #tpu.memory_space<vmem>>, vector<8x32xf32>
    tpu.vector_store %arg12[%c0_30, %c96], %106 {strides = array<i32>} : memref<16x128xf32, #tpu.memory_space<vmem>>, vector<8x32xf32>,
    %108 = vector.extract_strided_slice %20 {offsets = [1, 0], sizes = [1, 8], strides = [1, 1]} : vector<2x8xf32> to vector<1x8xf32>
    %109 = vector.shape_cast %108 : vector<1x8xf32> to vector<1x8xf32>
    %110 = vector.broadcast %109 : vector<1x8xf32> to vector<8x8xf32>
    %111 = vector.extract_strided_slice %19 {offsets = [8, 0], sizes = [8, 32], strides = [1, 1]} : vector<16x384xf32> to vector<8x32xf32>
    %112 = vector.extract_strided_slice %19 {offsets = [8, 128], sizes = [8, 32], strides = [1, 1]} : vector<16x384xf32> to vector<8x32xf32>
    %113 = vector.extract_strided_slice %19 {offsets = [8, 256], sizes = [8, 32], strides = [1, 1]} : vector<16x384xf32> to vector<8x32xf32>
    %114 = arith.truncf %111 : vector<8x32xf32> to vector<8x32xbf16>
    %115 = arith.truncf %112 : vector<8x32xf32> to vector<8x32xbf16>
    %cst_31 = arith.constant dense<0.000000e+00> : vector<8x8xf32>
    %116 = tpu.matmul %114, %115, %cst_31 {dimension_numbers = #tpu.dot_dimension_numbers<[1], [1], [0], [0], [0, 0, 1, 0], [], []>} : vector<8x32xbf16>, vector<8x32xbf16>, vector<8x8xf32> -> vector<8x8xf32>
    %117 = arith.addf %116, %110 : vector<8x8xf32>
    %cst_32 = arith.constant dense<0xFF800000> : vector<8xf32>
    %118 = vector.multi_reduction <maximumf>, %117, %cst_32 [1] : vector<8x8xf32> to vector<8xf32>
    %119 = vector.shape_cast %118 : vector<8xf32> to vector<8x1xf32>
    %120 = vector.broadcast %119 : vector<8x1xf32> to vector<8x8xf32>
    %121 = arith.subf %117, %120 : vector<8x8xf32>
    %122 = math.exp %121 : vector<8x8xf32>
    %cst_33 = arith.constant dense<0.000000e+00> : vector<8xf32>
    %123 = vector.multi_reduction <add>, %122, %cst_33 [1] : vector<8x8xf32> to vector<8xf32>
    %124 = vector.shape_cast %123 : vector<8xf32> to vector<8x1xf32>
    %125 = tpu.reciprocal %124 {approx = true} : vector<8x1xf32> -> vector<8x1xf32>
    %126 = vector.broadcast %125 : vector<8x1xf32> to vector<8x8xf32>
    %127 = arith.mulf %122, %126 : vector<8x8xf32>
    %128 = arith.truncf %127 : vector<8x8xf32> to vector<8x8xbf16>
    %129 = arith.truncf %113 : vector<8x32xf32> to vector<8x32xbf16>
    %cst_34 = arith.constant dense<0.000000e+00> : vector<8x32xf32>
    %130 = tpu.matmul %128, %129, %cst_34 {dimension_numbers = #tpu.dot_dimension_numbers<[1], [0], [0], [1], [0, 0, 1, 1], [], []>} : vector<8x8xbf16>, vector<8x32xbf16>, vector<8x32xf32> -> vector<8x32xf32>
    %c8 = arith.constant 8 : index
    %c0_35 = arith.constant 0 : index
    %131 = vector.load %arg12[%c8, %c0_35] : memref<16x128xf32, #tpu.memory_space<vmem>>, vector<8x32xf32>
    tpu.vector_store %arg12[%c8, %c0_35], %130 {strides = array<i32>} : memref<16x128xf32, #tpu.memory_space<vmem>>, vector<8x32xf32>,
    %132 = vector.extract_strided_slice %19 {offsets = [8, 32], sizes = [8, 32], strides = [1, 1]} : vector<16x384xf32> to vector<8x32xf32>
    %133 = vector.extract_strided_slice %19 {offsets = [8, 160], sizes = [8, 32], strides = [1, 1]} : vector<16x384xf32> to vector<8x32xf32>
    %134 = vector.extract_strided_slice %19 {offsets = [8, 288], sizes = [8, 32], strides = [1, 1]} : vector<16x384xf32> to vector<8x32xf32>
    %135 = arith.truncf %132 : vector<8x32xf32> to vector<8x32xbf16>
    %136 = arith.truncf %133 : vector<8x32xf32> to vector<8x32xbf16>
    %cst_36 = arith.constant dense<0.000000e+00> : vector<8x8xf32>
    %137 = tpu.matmul %135, %136, %cst_36 {dimension_numbers = #tpu.dot_dimension_numbers<[1], [1], [0], [0], [0, 0, 1, 0], [], []>} : vector<8x32xbf16>, vector<8x32xbf16>, vector<8x8xf32> -> vector<8x8xf32>
    %138 = arith.addf %137, %110 : vector<8x8xf32>
    %cst_37 = arith.constant dense<0xFF800000> : vector<8xf32>
    %139 = vector.multi_reduction <maximumf>, %138, %cst_37 [1] : vector<8x8xf32> to vector<8xf32>
    %140 = vector.shape_cast %139 : vector<8xf32> to vector<8x1xf32>
    %141 = vector.broadcast %140 : vector<8x1xf32> to vector<8x8xf32>
    %142 = arith.subf %138, %141 : vector<8x8xf32>
    %143 = math.exp %142 : vector<8x8xf32>
    %cst_38 = arith.constant dense<0.000000e+00> : vector<8xf32>
    %144 = vector.multi_reduction <add>, %143, %cst_38 [1] : vector<8x8xf32> to vector<8xf32>
    %145 = vector.shape_cast %144 : vector<8xf32> to vector<8x1xf32>
    %146 = tpu.reciprocal %145 {approx = true} : vector<8x1xf32> -> vector<8x1xf32>
    %147 = vector.broadcast %146 : vector<8x1xf32> to vector<8x8xf32>
    %148 = arith.mulf %143, %147 : vector<8x8xf32>
    %149 = arith.truncf %148 : vector<8x8xf32> to vector<8x8xbf16>
    %150 = arith.truncf %134 : vector<8x32xf32> to vector<8x32xbf16>
    %cst_39 = arith.constant dense<0.000000e+00> : vector<8x32xf32>
    %151 = tpu.matmul %149, %150, %cst_39 {dimension_numbers = #tpu.dot_dimension_numbers<[1], [0], [0], [1], [0, 0, 1, 1], [], []>} : vector<8x8xbf16>, vector<8x32xbf16>, vector<8x32xf32> -> vector<8x32xf32>
    %c8_40 = arith.constant 8 : index
    %c32_41 = arith.constant 32 : index
    %152 = vector.load %arg12[%c8_40, %c32_41] : memref<16x128xf32, #tpu.memory_space<vmem>>, vector<8x32xf32>
    tpu.vector_store %arg12[%c8_40, %c32_41], %151 {strides = array<i32>} : memref<16x128xf32, #tpu.memory_space<vmem>>, vector<8x32xf32>,
    %153 = vector.extract_strided_slice %19 {offsets = [8, 64], sizes = [8, 32], strides = [1, 1]} : vector<16x384xf32> to vector<8x32xf32>
    %154 = vector.extract_strided_slice %19 {offsets = [8, 192], sizes = [8, 32], strides = [1, 1]} : vector<16x384xf32> to vector<8x32xf32>
    %155 = vector.extract_strided_slice %19 {offsets = [8, 320], sizes = [8, 32], strides = [1, 1]} : vector<16x384xf32> to vector<8x32xf32>
    %156 = arith.truncf %153 : vector<8x32xf32> to vector<8x32xbf16>
    %157 = arith.truncf %154 : vector<8x32xf32> to vector<8x32xbf16>
    %cst_42 = arith.constant dense<0.000000e+00> : vector<8x8xf32>
    %158 = tpu.matmul %156, %157, %cst_42 {dimension_numbers = #tpu.dot_dimension_numbers<[1], [1], [0], [0], [0, 0, 1, 0], [], []>} : vector<8x32xbf16>, vector<8x32xbf16>, vector<8x8xf32> -> vector<8x8xf32>
    %159 = arith.addf %158, %110 : vector<8x8xf32>
    %cst_43 = arith.constant dense<0xFF800000> : vector<8xf32>
    %160 = vector.multi_reduction <maximumf>, %159, %cst_43 [1] : vector<8x8xf32> to vector<8xf32>
    %161 = vector.shape_cast %160 : vector<8xf32> to vector<8x1xf32>
    %162 = vector.broadcast %161 : vector<8x1xf32> to vector<8x8xf32>
    %163 = arith.subf %159, %162 : vector<8x8xf32>
    %164 = math.exp %163 : vector<8x8xf32>
    %cst_44 = arith.constant dense<0.000000e+00> : vector<8xf32>
    %165 = vector.multi_reduction <add>, %164, %cst_44 [1] : vector<8x8xf32> to vector<8xf32>
    %166 = vector.shape_cast %165 : vector<8xf32> to vector<8x1xf32>
    %167 = tpu.reciprocal %166 {approx = true} : vector<8x1xf32> -> vector<8x1xf32>
    %168 = vector.broadcast %167 : vector<8x1xf32> to vector<8x8xf32>
    %169 = arith.mulf %164, %168 : vector<8x8xf32>
    %170 = arith.truncf %169 : vector<8x8xf32> to vector<8x8xbf16>
    %171 = arith.truncf %155 : vector<8x32xf32> to vector<8x32xbf16>
    %cst_45 = arith.constant dense<0.000000e+00> : vector<8x32xf32>
    %172 = tpu.matmul %170, %171, %cst_45 {dimension_numbers = #tpu.dot_dimension_numbers<[1], [0], [0], [1], [0, 0, 1, 1], [], []>} : vector<8x8xbf16>, vector<8x32xbf16>, vector<8x32xf32> -> vector<8x32xf32>
    %c8_46 = arith.constant 8 : index
    %c64_47 = arith.constant 64 : index
    %173 = vector.load %arg12[%c8_46, %c64_47] : memref<16x128xf32, #tpu.memory_space<vmem>>, vector<8x32xf32>
    tpu.vector_store %arg12[%c8_46, %c64_47], %172 {strides = array<i32>} : memref<16x128xf32, #tpu.memory_space<vmem>>, vector<8x32xf32>,
    %174 = vector.extract_strided_slice %19 {offsets = [8, 96], sizes = [8, 32], strides = [1, 1]} : vector<16x384xf32> to vector<8x32xf32>
    %175 = vector.extract_strided_slice %19 {offsets = [8, 224], sizes = [8, 32], strides = [1, 1]} : vector<16x384xf32> to vector<8x32xf32>
    %176 = vector.extract_strided_slice %19 {offsets = [8, 352], sizes = [8, 32], strides = [1, 1]} : vector<16x384xf32> to vector<8x32xf32>
    %177 = arith.truncf %174 : vector<8x32xf32> to vector<8x32xbf16>
    %178 = arith.truncf %175 : vector<8x32xf32> to vector<8x32xbf16>
    %cst_48 = arith.constant dense<0.000000e+00> : vector<8x8xf32>
    %179 = tpu.matmul %177, %178, %cst_48 {dimension_numbers = #tpu.dot_dimension_numbers<[1], [1], [0], [0], [0, 0, 1, 0], [], []>} : vector<8x32xbf16>, vector<8x32xbf16>, vector<8x8xf32> -> vector<8x8xf32>
    %180 = arith.addf %179, %110 : vector<8x8xf32>
    %cst_49 = arith.constant dense<0xFF800000> : vector<8xf32>
    %181 = vector.multi_reduction <maximumf>, %180, %cst_49 [1] : vector<8x8xf32> to vector<8xf32>
    %182 = vector.shape_cast %181 : vector<8xf32> to vector<8x1xf32>
    %183 = vector.broadcast %182 : vector<8x1xf32> to vector<8x8xf32>
    %184 = arith.subf %180, %183 : vector<8x8xf32>
    %185 = math.exp %184 : vector<8x8xf32>
    %cst_50 = arith.constant dense<0.000000e+00> : vector<8xf32>
    %186 = vector.multi_reduction <add>, %185, %cst_50 [1] : vector<8x8xf32> to vector<8xf32>
    %187 = vector.shape_cast %186 : vector<8xf32> to vector<8x1xf32>
    %188 = tpu.reciprocal %187 {approx = true} : vector<8x1xf32> -> vector<8x1xf32>
    %189 = vector.broadcast %188 : vector<8x1xf32> to vector<8x8xf32>
    %190 = arith.mulf %185, %189 : vector<8x8xf32>
    %191 = arith.truncf %190 : vector<8x8xf32> to vector<8x8xbf16>
    %192 = arith.truncf %176 : vector<8x32xf32> to vector<8x32xbf16>
    %cst_51 = arith.constant dense<0.000000e+00> : vector<8x32xf32>
    %193 = tpu.matmul %191, %192, %cst_51 {dimension_numbers = #tpu.dot_dimension_numbers<[1], [0], [0], [1], [0, 0, 1, 1], [], []>} : vector<8x8xbf16>, vector<8x32xbf16>, vector<8x32xf32> -> vector<8x32xf32>
    %c8_52 = arith.constant 8 : index
    %c96_53 = arith.constant 96 : index
    %194 = vector.load %arg12[%c8_52, %c96_53] : memref<16x128xf32, #tpu.memory_space<vmem>>, vector<8x32xf32>
    tpu.vector_store %arg12[%c8_52, %c96_53], %193 {strides = array<i32>} : memref<16x128xf32, #tpu.memory_space<vmem>>, vector<8x32xf32>,
    %c0_54 = arith.constant 0 : index
    %c0_55 = arith.constant 0 : index
    %195 = vector.load %arg12[%c0_54, %c0_55] : memref<16x128xf32, #tpu.memory_space<vmem>>, vector<16x128xf32>
    %196 = arith.truncf %195 : vector<16x128xf32> to vector<16x128xbf16>
    %c0_56 = arith.constant 0 : index
    %c0_57 = arith.constant 0 : index
    %c0_58 = arith.constant 0 : index
    %197 = vector.load %arg6[%c0_56, %c0_57, %c0_58] : memref<1x128x128xbf16, #tpu.memory_space<vmem>>, vector<1x128x128xbf16>
    %198 = vector.shape_cast %197 : vector<1x128x128xbf16> to vector<128x128xbf16>
    %cst_59 = arith.constant dense<0.000000e+00> : vector<16x128xf32>
    %199 = tpu.matmul %196, %198, %cst_59 {dimension_numbers = #tpu.dot_dimension_numbers<[1], [0], [0], [1], [0, 0, 1, 1], [], []>} : vector<16x128xbf16>, vector<128x128xbf16>, vector<16x128xf32> -> vector<16x128xf32>
    %200 = vector.broadcast %8 : vector<1x128xf32> to vector<16x128xf32>
    %201 = arith.addf %199, %200 : vector<16x128xf32>
    %202 = arith.addf %201, %3 : vector<16x128xf32>
    %cst_60 = arith.constant dense<0.000000e+00> : vector<16xf32>
    %203 = vector.multi_reduction <add>, %202, %cst_60 [1] : vector<16x128xf32> to vector<16xf32>
    %204 = vector.shape_cast %203 : vector<16xf32> to vector<16x1xf32>
    %cst_61 = arith.constant 1.280000e+02 : f32
    %205 = vector.broadcast %cst_61 : f32 to vector<16x1xf32>
    %206 = arith.divf %204, %205 : vector<16x1xf32>
    %207 = vector.broadcast %206 : vector<16x1xf32> to vector<16x128xf32>
    %208 = arith.subf %202, %207 : vector<16x128xf32>
    %209 = arith.mulf %208, %208 : vector<16x128xf32>
    %cst_62 = arith.constant dense<0.000000e+00> : vector<16xf32>
    %210 = vector.multi_reduction <add>, %209, %cst_62 [1] : vector<16x128xf32> to vector<16xf32>
    %211 = vector.shape_cast %210 : vector<16xf32> to vector<16x1xf32>
    %cst_63 = arith.constant 1.280000e+02 : f32
    %212 = vector.broadcast %cst_63 : f32 to vector<16x1xf32>
    %213 = arith.divf %211, %212 : vector<16x1xf32>
    %214 = vector.broadcast %206 : vector<16x1xf32> to vector<16x128xf32>
    %215 = arith.subf %202, %214 : vector<16x128xf32>
    %cst_64 = arith.constant 9.99999996E-13 : f32
    %216 = vector.broadcast %cst_64 : f32 to vector<16x1xf32>
    %217 = arith.addf %213, %216 : vector<16x1xf32>
    %218 = math.rsqrt %217 : vector<16x1xf32>
    %219 = vector.broadcast %218 : vector<16x1xf32> to vector<16x128xf32>
    %220 = arith.mulf %215, %219 : vector<16x128xf32>
    %221 = vector.broadcast %10 : vector<1x128xf32> to vector<16x128xf32>
    %222 = arith.mulf %220, %221 : vector<16x128xf32>
    %223 = vector.broadcast %11 : vector<1x128xf32> to vector<16x128xf32>
    %224 = arith.addf %222, %223 : vector<16x128xf32>
    %225 = arith.truncf %224 : vector<16x128xf32> to vector<16x128xbf16>
    %c0_65 = arith.constant 0 : index
    %c0_66 = arith.constant 0 : index
    %c0_67 = arith.constant 0 : index
    %226 = vector.load %arg7[%c0_65, %c0_66, %c0_67] : memref<1x128x256xbf16, #tpu.memory_space<vmem>>, vector<1x128x256xbf16>
    %227 = vector.shape_cast %226 : vector<1x128x256xbf16> to vector<128x256xbf16>
    %cst_68 = arith.constant dense<0.000000e+00> : vector<16x256xf32>
    %228 = tpu.matmul %225, %227, %cst_68 {dimension_numbers = #tpu.dot_dimension_numbers<[1], [0], [0], [1], [0, 0, 1, 1], [], []>} : vector<16x128xbf16>, vector<128x256xbf16>, vector<16x256xf32> -> vector<16x256xf32>
    %229 = vector.broadcast %7 : vector<1x256xf32> to vector<16x256xf32>
    %230 = arith.addf %228, %229 : vector<16x256xf32>
    %231 = arith.mulf %230, %230 : vector<16x256xf32>
    %232 = arith.mulf %230, %231 : vector<16x256xf32>
    %cst_69 = arith.constant 4.471500e-02 : f32
    %233 = vector.broadcast %cst_69 : f32 to vector<16x256xf32>
    %234 = arith.mulf %233, %232 : vector<16x256xf32>
    %235 = arith.addf %230, %234 : vector<16x256xf32>
    %cst_70 = arith.constant 0.797884583 : f32
    %236 = vector.broadcast %cst_70 : f32 to vector<16x256xf32>
    %237 = arith.mulf %236, %235 : vector<16x256xf32>
    %238 = math.tanh %237 : vector<16x256xf32>
    %cst_71 = arith.constant 1.000000e+00 : f32
    %239 = vector.broadcast %cst_71 : f32 to vector<16x256xf32>
    %240 = arith.addf %239, %238 : vector<16x256xf32>
    %cst_72 = arith.constant 5.000000e-01 : f32
    %241 = vector.broadcast %cst_72 : f32 to vector<16x256xf32>
    %242 = arith.mulf %241, %240 : vector<16x256xf32>
    %243 = arith.mulf %230, %242 : vector<16x256xf32>
    %244 = arith.truncf %243 : vector<16x256xf32> to vector<16x256xbf16>
    %c0_73 = arith.constant 0 : index
    %c0_74 = arith.constant 0 : index
    %c0_75 = arith.constant 0 : index
    %245 = vector.load %arg8[%c0_73, %c0_74, %c0_75] : memref<1x256x128xbf16, #tpu.memory_space<vmem>>, vector<1x256x128xbf16>
    %246 = vector.shape_cast %245 : vector<1x256x128xbf16> to vector<256x128xbf16>
    %cst_76 = arith.constant dense<0.000000e+00> : vector<16x128xf32>
    %247 = tpu.matmul %244, %246, %cst_76 {dimension_numbers = #tpu.dot_dimension_numbers<[1], [0], [0], [1], [0, 0, 1, 1], [], []>} : vector<16x256xbf16>, vector<256x128xbf16>, vector<16x128xf32> -> vector<16x128xf32>
    %248 = vector.broadcast %9 : vector<1x128xf32> to vector<16x128xf32>
    %249 = arith.addf %247, %248 : vector<16x128xf32>
    %250 = arith.addf %249, %224 : vector<16x128xf32>
    %cst_77 = arith.constant dense<0.000000e+00> : vector<16xf32>
    %251 = vector.multi_reduction <add>, %250, %cst_77 [1] : vector<16x128xf32> to vector<16xf32>
    %252 = vector.shape_cast %251 : vector<16xf32> to vector<16x1xf32>
    %cst_78 = arith.constant 1.280000e+02 : f32
    %253 = vector.broadcast %cst_78 : f32 to vector<16x1xf32>
    %254 = arith.divf %252, %253 : vector<16x1xf32>
    %255 = vector.broadcast %254 : vector<16x1xf32> to vector<16x128xf32>
    %256 = arith.subf %250, %255 : vector<16x128xf32>
    %257 = arith.mulf %256, %256 : vector<16x128xf32>
    %cst_79 = arith.constant dense<0.000000e+00> : vector<16xf32>
    %258 = vector.multi_reduction <add>, %257, %cst_79 [1] : vector<16x128xf32> to vector<16xf32>
    %259 = vector.shape_cast %258 : vector<16xf32> to vector<16x1xf32>
    %cst_80 = arith.constant 1.280000e+02 : f32
    %260 = vector.broadcast %cst_80 : f32 to vector<16x1xf32>
    %261 = arith.divf %259, %260 : vector<16x1xf32>
    %262 = vector.broadcast %254 : vector<16x1xf32> to vector<16x128xf32>
    %263 = arith.subf %250, %262 : vector<16x128xf32>
    %cst_81 = arith.constant 9.99999996E-13 : f32
    %264 = vector.broadcast %cst_81 : f32 to vector<16x1xf32>
    %265 = arith.addf %261, %264 : vector<16x1xf32>
    %266 = math.rsqrt %265 : vector<16x1xf32>
    %267 = vector.broadcast %266 : vector<16x1xf32> to vector<16x128xf32>
    %268 = arith.mulf %263, %267 : vector<16x128xf32>
    %269 = vector.broadcast %12 : vector<1x128xf32> to vector<16x128xf32>
    %270 = arith.mulf %268, %269 : vector<16x128xf32>
    %271 = vector.broadcast %13 : vector<1x128xf32> to vector<16x128xf32>
    %272 = arith.addf %270, %271 : vector<16x128xf32>
    %c0_82 = arith.constant 0 : index
    %c0_83 = arith.constant 0 : index
    %273 = vector.load %arg11[%c0_82, %c0_83] : memref<16x128xf32, #tpu.memory_space<vmem>>, vector<16x128xf32>
    tpu.vector_store %arg11[%c0_82, %c0_83], %272 {strides = array<i32>} : memref<16x128xf32, #tpu.memory_space<vmem>>, vector<16x128xf32>,
    %c1_i32 = arith.constant 1 : i32
    %274 = arith.cmpi eq, %arg0, %c1_i32 : i32
    %275 = arith.extui %274 : i1 to i32
    %c0_i32_84 = arith.constant 0 : i32
    %276 = arith.cmpi ne, %275, %c0_i32_84 : i32
    scf.if %276 {
      %277 = tpu.iota {dimensions = array<i32: 0>} : vector<8x1xi32>
      %c0_85 = arith.constant 0 : index
      %278 = memref.load %arg1[%c0_85] : memref<2xi32, #tpu.memory_space<smem>>
      %279 = vector.broadcast %278 : i32 to vector<8x1xi32>
      %280 = arith.cmpi eq, %277, %279 : vector<8x1xi32>
      %281 = arith.extui %280 : vector<8x1xi1> to vector<8x1xi32>
      %282 = arith.sitofp %281 : vector<8x1xi32> to vector<8x1xf32>
      %283 = vector.extract_strided_slice %272 {offsets = [0, 0], sizes = [8, 128], strides = [1, 1]} : vector<16x128xf32> to vector<8x128xf32>
      %284 = vector.broadcast %282 : vector<8x1xf32> to vector<8x128xf32>
      %285 = arith.mulf %283, %284 : vector<8x128xf32>
      %cst_86 = arith.constant dense<0.000000e+00> : vector<128xf32>
      %286 = vector.multi_reduction <add>, %285, %cst_86 [0] : vector<8x128xf32> to vector<128xf32>
      %287 = vector.shape_cast %286 : vector<128xf32> to vector<1x128xf32>
      %c0_87 = arith.constant 0 : index
      %c0_88 = arith.constant 0 : index
      %288 = vector.load %arg10[%c0_87, %c0_88] : memref<2x128xf32, #tpu.memory_space<vmem>>, vector<1x128xf32>
      tpu.vector_store %arg10[%c0_87, %c0_88], %287 {strides = array<i32>} : memref<2x128xf32, #tpu.memory_space<vmem>>, vector<1x128xf32>,
      %289 = tpu.iota {dimensions = array<i32: 0>} : vector<8x1xi32>
      %c1 = arith.constant 1 : index
      %290 = memref.load %arg1[%c1] : memref<2xi32, #tpu.memory_space<smem>>
      %291 = vector.broadcast %290 : i32 to vector<8x1xi32>
      %292 = arith.cmpi eq, %289, %291 : vector<8x1xi32>
      %293 = arith.extui %292 : vector<8x1xi1> to vector<8x1xi32>
      %294 = arith.sitofp %293 : vector<8x1xi32> to vector<8x1xf32>
      %295 = vector.extract_strided_slice %272 {offsets = [8, 0], sizes = [8, 128], strides = [1, 1]} : vector<16x128xf32> to vector<8x128xf32>
      %296 = vector.broadcast %294 : vector<8x1xf32> to vector<8x128xf32>
      %297 = arith.mulf %295, %296 : vector<8x128xf32>
      %cst_89 = arith.constant dense<0.000000e+00> : vector<128xf32>
      %298 = vector.multi_reduction <add>, %297, %cst_89 [0] : vector<8x128xf32> to vector<128xf32>
      %299 = vector.shape_cast %298 : vector<128xf32> to vector<1x128xf32>
      %c1_90 = arith.constant 1 : index
      %c0_91 = arith.constant 0 : index
      %300 = vector.load %arg10[%c1_90, %c0_91] : memref<2x128xf32, #tpu.memory_space<vmem>>, vector<1x128xf32>
      tpu.vector_store %arg10[%c1_90, %c0_91], %299 {strides = array<i32>} : memref<2x128xf32, #tpu.memory_space<vmem>>, vector<1x128xf32>,
      %c0_92 = arith.constant 0 : index
      %c0_93 = arith.constant 0 : index
      %301 = vector.load %arg10[%c0_92, %c0_93] : memref<2x128xf32, #tpu.memory_space<vmem>>, vector<2x128xf32>
      %302 = arith.mulf %301, %301 : vector<2x128xf32>
      %cst_94 = arith.constant dense<0.000000e+00> : vector<2xf32>
      %303 = vector.multi_reduction <add>, %302, %cst_94 [1] : vector<2x128xf32> to vector<2xf32>
      %304 = vector.shape_cast %303 : vector<2xf32> to vector<2x1xf32>
      %305 = math.sqrt %304 : vector<2x1xf32>
      %cst_95 = arith.constant 1.000000e+00 : f32
      %306 = vector.broadcast %cst_95 : f32 to vector<2x1xf32>
      %307 = arith.cmpf ogt, %305, %306 : vector<2x1xf32>
      %cst_96 = arith.constant 1.000000e+00 : f32
      %308 = vector.broadcast %cst_96 : f32 to vector<2x1xf32>
      %309 = arith.select %307, %305, %308 : vector<2x1xi1>, vector<2x1xf32>
      %310 = vector.broadcast %309 : vector<2x1xf32> to vector<2x128xf32>
      %311 = arith.divf %301, %310 : vector<2x128xf32>
      %c0_97 = arith.constant 0 : index
      %c0_98 = arith.constant 0 : index
      %312 = vector.load %arg10[%c0_97, %c0_98] : memref<2x128xf32, #tpu.memory_space<vmem>>, vector<2x128xf32>
      tpu.vector_store %arg10[%c0_97, %c0_98], %311 {strides = array<i32>} : memref<2x128xf32, #tpu.memory_space<vmem>>, vector<2x128xf32>,
    } else {
    }
    return
  }
  func.func @transform_0(%arg0: i32, %arg1: memref<2xi32, #tpu.memory_space<smem>>) -> (i32, i32) {
    %c0_i32 = arith.constant 0 : i32
    %c0_i32_0 = arith.constant 0 : i32
    %c0_i32_1 = arith.constant 0 : i32
    return %c0_i32, %c0_i32_0 : i32, i32
  }
  func.func @transform_1(%arg0: i32, %arg1: memref<2xi32, #tpu.memory_space<smem>>) -> (i32, i32) {
    %c0_i32 = arith.constant 0 : i32
    %c0_i32_0 = arith.constant 0 : i32
    %c0_i32_1 = arith.constant 0 : i32
    return %c0_i32, %c0_i32_0 : i32, i32
  }
  func.func @transform_2(%arg0: i32, %arg1: memref<2xi32, #tpu.memory_space<smem>>) -> (i32, i32) {
    %c0_i32 = arith.constant 0 : i32
    %c0_i32_0 = arith.constant 0 : i32
    %c0_i32_1 = arith.constant 0 : i32
    return %c0_i32, %c0_i32_0 : i32, i32
  }
  func.func @transform_3(%arg0: i32, %arg1: memref<2xi32, #tpu.memory_space<smem>>) -> (i32, i32, i32) {
    %c0_i32 = arith.constant 0 : i32
    %c0_i32_0 = arith.constant 0 : i32
    %c0_i32_1 = arith.constant 0 : i32
    return %arg0, %c0_i32, %c0_i32_0 : i32, i32, i32
  }
  func.func @transform_4(%arg0: i32, %arg1: memref<2xi32, #tpu.memory_space<smem>>) -> (i32, i32, i32) {
    %c0_i32 = arith.constant 0 : i32
    %c0_i32_0 = arith.constant 0 : i32
    %c0_i32_1 = arith.constant 0 : i32
    return %arg0, %c0_i32, %c0_i32_0 : i32, i32, i32
  }
  func.func @transform_5(%arg0: i32, %arg1: memref<2xi32, #tpu.memory_space<smem>>) -> (i32, i32, i32) {
    %c0_i32 = arith.constant 0 : i32
    %c0_i32_0 = arith.constant 0 : i32
    %c0_i32_1 = arith.constant 0 : i32
    return %arg0, %c0_i32, %c0_i32_0 : i32, i32, i32
  }
  func.func @transform_6(%arg0: i32, %arg1: memref<2xi32, #tpu.memory_space<smem>>) -> (i32, i32, i32) {
    %c0_i32 = arith.constant 0 : i32
    %c0_i32_0 = arith.constant 0 : i32
    %c0_i32_1 = arith.constant 0 : i32
    return %arg0, %c0_i32, %c0_i32_0 : i32, i32, i32
  }
  func.func @transform_7(%arg0: i32, %arg1: memref<2xi32, #tpu.memory_space<smem>>) -> (i32, i32, i32) {
    %c0_i32 = arith.constant 0 : i32
    %c0_i32_0 = arith.constant 0 : i32
    %c0_i32_1 = arith.constant 0 : i32
    return %arg0, %c0_i32, %c0_i32_0 : i32, i32, i32
  }
  func.func @transform_8(%arg0: i32, %arg1: memref<2xi32, #tpu.memory_space<smem>>) -> (i32, i32) {
    %c0_i32 = arith.constant 0 : i32
    %c0_i32_0 = arith.constant 0 : i32
    %c0_i32_1 = arith.constant 0 : i32
    return %c0_i32, %c0_i32_0 : i32, i32
  }
}

</mosaic_0001>

<bundles_post_ra>
// kernel: star_encoder_forward.1
= control target key start
LH: loop header
LB: loop body
LE: loop exit
PB: predicated region body
PF: predicated region fallthrough
CT: control target
= control target key end

     0   :  { %s2584_s12 = smov [#allocation5]   ;;  %s3103_s0 = inlined_call_operand.vmem [shape: s32[2], index: 0, kind: input, shape index: {}]   ;;  %s3104_s1 = inlined_call_operand.vmem [shape: f32[16,128], index: 1, kind: input, shape index: {}]   ;;  %s3105_s2 = inlined_call_operand.vmem [shape: f32[2,8], index: 2, kind: input, shape index: {}]   ;;  %s3106_s3 = inlined_call_operand.vmem [shape: f32[2,128], index: 3, kind: input, shape index: {}]   ;;  %s3107_s4 = inlined_call_operand.hbm [shape: bf16[2,128,384], index: 4, kind: input, shape index: {}]   ;;  %s3108_s5 = inlined_call_operand.vmem [shape: bf16[2,128,128], index: 5, kind: input, shape index: {}]   ;;  %s3109_s6 = inlined_call_operand.hbm [shape: bf16[2,128,256], index: 6, kind: input, shape index: {}]   ;;  %s3110_s7 = inlined_call_operand.hbm [shape: bf16[2,256,128], index: 7, kind: input, shape index: {}]   ;;  %s3111_s8 = inlined_call_operand.vmem [shape: f32[2,8,384], index: 8, kind: input, shape index: {}]   ;;  %s3112_s9 = inlined_call_operand.hbm [shape: f32[2,128], index: 9, kind: output, shape index: {}]  }
   0x1   :  { %3117 = sst [smem:[#allocation20_spill]] %s3109_s6  ;;  %s15_s11 = sshll.u32 %s3103_s0, 4  ;;  %s16_s11 = int_to_ptr.vmem [resolvable:$true] %s15_s11 }
   0x2   :  { %18 = dma.vmem_to_smem %s16_s11, 16, %s2584_s12, [#allocation4] }
   0x3   :  { %2554 = dma.done.wait [#allocation4], 16 }
   0x4   :  { %2555 = vsyncadd [#allocation4], 4294967280 }
   0x5   :  { %21 = sfence }
   0x6   :  { %22 = vsyncpa [#allocation7], 0 }
   0x7   :  { %24 = vsyncpa [#allocation7 + $0x1], 0 }
   0x8   :  { %25 = vsyncpa [#allocation10], 0 }
   0x9   :  { %27 = vsyncpa [#allocation10 + $0x1], 0 }
   0xa   :  { %28 = vsyncpa [#allocation8], 0  ;;  %s2651_s13 = smov 0   ;;  %s2653_s14 = smov 0  }
   0xb   :  { %s2655_s15 = smov 0   ;;  %s2657_s16 = smov 0  }
   0xc LB: > { %3118 = sst [smem:[#allocation17_spill]] %s2578_s15  ;;  %s2670_s0 = sadd.s32 4294967295, %s2582_s16   ;;  %s2582_s16 = sphi %s2657_s16, %s3126_s16   ;;  %s2578_s15 = sphi %s2655_s15, %s3128_s15   ;;  %s2574_s14 = sphi %s2653_s14, %s3130_s14   ;;  %s2570_s13 = sphi %s2651_s13, %s3129_s13  }
   0xd   : > { %s2673_s17 = sadd.s32 1, %s2582_s16   ;;  %s104_s19 = sadd.s32 1, %s2578_s15 }
   0xe   : > { %3119 = sst [smem:[#allocation18_spill]] %s2673_s17  ;;  %s101_s18 = ssub.s32 %s2582_s16, %s2673_s17 }
   0xf   : > { %p102_p0 = scmp.eq.s32.totalorder %s101_s18, 0  ;;  %p111_p1 = scmp.ne.s32.totalorder %s2578_s15, %s2574_s14 }
  0x10   : > { %p112_p2 = scmp.eq.s32.totalorder %s2582_s16, 0  ;;  %p117_p3 = scmp.ne.s32.totalorder %s2574_s14, %s2570_s13 }
  0x11   : > { %s2683_s20 = scalar_select %p102_p0, %s2578_s15, %s104_s19  }
  0x12   : > { %p113_p4 = por %p112_p2, %p111_p1  ;;  %p118_p5 = scmp.eq.s32.totalorder %s2670_s0, 0 }
  0x13   : > { %3120 = sst [smem:[#allocation19_spill]] %s2683_s20  ;;  %p2298_p6 = scmp.lt.s32.totalorder %s2582_s16, 2 }
  0x14   : > { %p2687_p7 = por %p118_p5, %p117_p3  ;;  %s2692_s22 = sand.u32 1, %s2578_s15  }
  0x15   : > { %p2694_p8 = pnand %p2298_p6, %p113_p4  ;;  %s305_s24 = sand.u32 1, %s2582_s16  }
  0x16   : > { %s3113_s25 = sshll.u32 %s2692_s22, 7  ;;  %s2207_s26 = sshll.u32 %s2582_s16, 7 }
  0x17   : > { %s309_s27 = scalar_lea.vmem [#allocation9], %s3113_s25  ;;  %s3123_s6 = sld [smem:[#allocation20_spill]] }
  0x18   : > { %s317_s28 = sshll.u32 %s309_s27, 4  ;;  %s2706_s12 = scalar_lea.sflag [#allocation10], %s305_s24  ;;  %s318_s28 = int_to_ptr.vmem [resolvable:$true] %s317_s28 }
  0x19   : > { %p2424_p10 = pneg %p2694_p8 }
  0x1d   : > { %s314_s10 = scalar_lea.hbm %s3123_s6, %s2207_s26  ;;  %s2427_s29 = scalar_lea.hbm %s3123_s6, 256 }
  0x1e   : > { %s315_s11 = sshll.u32 %s314_s10, 4  ;;  %s316_s11 = int_to_ptr.hbm [resolvable:$true] %s315_s11 }
  0x1f   : > { %s2420_s13 = sshra.s32 %s316_s11, 4  ;;  %s2421_s13 = int_to_ptr.hbm [resolvable:$true] %s2420_s13 }
  0x20   : > { %s2422_s18 = scalar_lea.hbm %s2421_s13, 128  ;;  %p2428_p13 = scmp.lt.s32.totalorder %s2421_s13, %s3123_s6 }
  0x21   : > { %p2423_p9 = scmp.ne.s32.totalorder %s2421_s13, %s2422_s18  ;;  %p2429_p0 = scmp.lt.s32.totalorder %s2427_s29, %s2422_s18 }
  0x23   : > { %p2425_p11 = pnand %p2424_p10, %p2423_p9  ;;  %p2430_p1 = por %p2429_p0, %p2428_p13 }
  0x25   : > { %p2426_p12 = pneg %p2425_p11 }
  0x27   : > { %p2431_p2 = pnand %p2430_p1, %p2426_p12 }
  0x29   : > { %2434 = shalt.err (!%p2431_p2)
}
  0x2a   : > { %s2585_s24 = smov 128   ;;  %s2586_s10 = smov 8  }
  0x2b   : > { %2294 = dma.hbm_to_vmem [thread:$0]  (!%p2694_p8), %s316_s11, 2048, %s318_s28, %s2706_s12, %s2585_s24, %s2585_s24, %s2586_s10  }
  0x2c   : > { %s336_s25 = scalar_lea.hbm %s3110_s7, %s2207_s26  ;;  %s3124_s18 = sshll.u32 %s2692_s22, 7 }
  0x2d   : > { %s337_s13 = sshll.u32 %s336_s25, 4  ;;  %s331_s29 = scalar_lea.vmem [#allocation11], %s3124_s18  ;;  %s2727_s13 = int_to_ptr.hbm [resolvable:$true] %s337_s13 }
  0x2e   : > { %s339_s30 = sshll.u32 %s331_s29, 4  ;;  %p1920_p3 = scmp.ge.s32.totalorder %s2582_s16, 1  ;;  %s2729_s30 = int_to_ptr.vmem [resolvable:$true] %s339_s30 }
  0x2f   : > { %p355_p4 = scmp.lt.s32.totalorder %s2582_s16, 3  ;;  %s2274_s6 = smul.u32 192, %s2692_s22 }
  0x30   : > { %s2275_s28 = smul.u32 192, %s2582_s16  ;;  %s276_s25 = scalar_lea.sflag [#allocation7], %s2692_s22 }
  0x31   : > { %p2734_p5 = pnand %p1920_p3, %p355_p4  ;;  %s279_s10 = scalar_lea.vmem [#allocation6], %s2274_s6 }
  0x32   : > { %s284_s24 = scalar_lea.hbm %s3107_s4, %s2275_s28  ;;  %s287_s19 = sshll.u32 %s279_s10, 4  ;;  %s288_s19 = int_to_ptr.vmem [resolvable:$true] %s287_s19 }
  0x33   : > { %s285_s27 = sshll.u32 %s284_s24, 4  ;;  %s2457_s17 = scalar_lea.hbm %s3107_s4, 384  ;;  %s286_s27 = int_to_ptr.hbm [resolvable:$true] %s285_s27 }
  0x34   : > { %s2450_s18 = sshra.s32 %s286_s27, 4  ;;  %s2451_s18 = int_to_ptr.hbm [resolvable:$true] %s2450_s18 }
  0x35   : > { %s2452_s29 = scalar_lea.hbm %s2451_s18, 192  ;;  %p2458_p12 = scmp.lt.s32.totalorder %s2451_s18, %s3107_s4 }
  0x36   : > { %p2453_p6 = scmp.ne.s32.totalorder %s2451_s18, %s2452_s29  ;;  %p2459_p13 = scmp.lt.s32.totalorder %s2457_s17, %s2452_s29 }
  0x38   : > { %p2455_p9 = pnand %p2453_p6, %p2424_p10  ;;  %p2460_p0 = por %p2459_p13, %p2458_p12 }
  0x3a   : > { %p2456_p11 = pneg %p2455_p9 }
  0x3c   : > { %p2461_p1 = pnand %p2460_p0, %p2456_p11 }
  0x3e   : > { %2464 = shalt.err (!%p2461_p1)
}
  0x3f   : > { %s2587_s6 = smov 192   ;;  %s2588_s22 = smov 12  }
  0x40   : > { %2291 = dma.hbm_to_vmem [thread:$0]  (!%p2694_p8), %s286_s27, 3072, %s288_s19, %s276_s25, %s2587_s6, %s2587_s6, %s2588_s22  }
  0x41   : > { %s2480_s26 = sshra.s32 %s2727_s13, 4  ;;  %s2487_s10 = scalar_lea.hbm %s3110_s7, 256  ;;  %s2481_s26 = int_to_ptr.hbm [resolvable:$true] %s2480_s26 }
  0x42   : > { %s2482_s24 = scalar_lea.hbm %s2481_s26, 128  ;;  %p2488_p6 = scmp.lt.s32.totalorder %s2481_s26, %s3110_s7 }
  0x43   : > { %p2483_p2 = scmp.ne.s32.totalorder %s2481_s26, %s2482_s24  ;;  %p2489_p9 = scmp.lt.s32.totalorder %s2487_s10, %s2482_s24 }
  0x45   : > { %p2485_p3 = pnand %p2483_p2, %p2424_p10  ;;  %p2490_p11 = por %p2489_p9, %p2488_p6 }
  0x47   : > { %p2486_p4 = pneg %p2485_p3 }
  0x49   : > { %p2491_p12 = pnand %p2490_p11, %p2486_p4 }
  0x4b   : > { %2494 = shalt.err (!%p2491_p12)
}
  0x4c   : > { %s2589_s19 = smov 64   ;;  %s2590_s27 = smov 4  }
  0x4d   : > { %2297 = dma.hbm_to_vmem [thread:$0]  (!%p2694_p8), %s2727_s13, 2048, %s2729_s30, %s2706_s12, %s2589_s19, %s2589_s19, %s2590_s27  }
  0x4e   : > { %359 = sbr.rel (%p2734_p5) target bundleno = 2898 (0xb52), region = 52  ;;  %s361_s25 = sand.u32 (!%p2734_p5), 1, %s2574_s14  }
  0x4f   : > { %s2276_s16 = smul.u32 (!%p2734_p5), 192, %s361_s25  ;;  %s362_s11 = scalar_lea.sflag (!%p2734_p5), [#allocation7], %s361_s25 }
  0x51   : > { %s2772_s28 = scalar_lea.vmem (!%p2734_p5), [#allocation6], %s2276_s16 }
  0x53   : > { %2557 = dma.done.wait (%p2687_p7), %s362_s11, 3072  }
  0x54   : > { %2559 = vsyncadd (%p2687_p7), %s362_s11, 4294964224  ;;  %s371_s6 = sand.u32 1, %s2670_s0   ;;  %s1921_s23 = sshll.u32 %s361_s25, 7 }
  0x55   : > { %s372_s12 = scalar_lea.sflag [#allocation10], %s371_s6  ;;  %s2779_s13 = scalar_lea.vmem [#allocation9], %s1921_s23 }
  0x56   : > { %2561 = dma.done.wait (%p2687_p7), %s372_s12, 4096  }
  0x57   : > { %2563 = vsyncadd (%p2687_p7), %s372_s12, 4294963200  ;;  %p434_p8 = scmp.lt.s32.totalorder %s2670_s0, 1  ;;  %s2797_s29 = scalar_lea.vmem [#allocation11], %s1921_s23 }
  0x58   : > { %p1926_p7 = scmp.ne.s32.totalorder %s2670_s0, 0 }
  0x59   : > { %s435_s20 = scalar_select %p434_p8, %s2670_s0, 1 }
  0x5a   : > { %448 = sbr.rel (%p1926_p7) target bundleno = 371 (0x173), region = 68 }
  0x5b   : > { %s2209_s30 = sshll.u32 %s435_s20, 6  ;;  %s2277_s22 = smul.u32 24, %s435_s20 }
  0x5c   : > { %s2790_s15 = scalar_lea.vmem %s3108_s5, %s2209_s30 }
  0x5d   : > { %s2795_s18 = scalar_lea.vmem %s3111_s8, %s2277_s22 }
  0x5f   : > { %v450_v0 = vld [vmem:[%s3104_s1] sm:$0xff]  ;;  %v451_v1 = vld [vmem:[%s3104_s1 + $0x8] sm:$0xff]  ;;  %v2591_v2 = vmov 128.0  }
  0x60   : > { %452 = vadd.xlane.f32.xlu0 %v450_v0  ;;  %2347 = vrcp.f32 %v2591_v2  ;;  %v449_v27 = vld [vmem:[%s3106_s3] sm:$0x3] }
  0x61   : > { %v499_v32 = vperm.slane %v449_v27, 0  ;;  %v502_v36 = vperm.slane %v449_v27, 1 }
  0x66   : > { %v2348_v3 = vpop.eup %2347 }
  0x67   : > { %v457_v4 = vmul.f32 128.0, %v2348_v3  ;;  %vm461_vm0 = vweird.f32 %v2348_v3 }
  0x68   : > { %454 = vadd.xlane.f32.xlu0 %v451_v1 }
  0x69   : > { %v458_v5 = vsub.f32 1.0, %v457_v4 }
  0x6b   : > { %v459_v6 = vmul.f32 %v2348_v3, %v458_v5 }
  0x6d   : > { %v460_v7 = vadd.f32 %v2348_v3, %v459_v6 }
  0x6f   : > { %v462_v8 = vsel %vm461_vm0, %v2348_v3, %v460_v7 }
  0xd3   : > { %v453_v9 = vpop.xlane.xlu0 %452 }
  0xd4   : > { %v463_v10 = vmul.f32 %v462_v8, %v453_v9 }
  0xd6   : > { %v465_v11 = vsub.f32 %v450_v0, %v463_v10 }
  0xd8   : > { %v467_v12 = vmul.f32 %v465_v11, %v465_v11 }
  0xda   : > { %469 = vadd.xlane.f32.xlu1 %v467_v12 }
  0xdb   : > { %v455_v13 = vpop.xlane.xlu0 %454 }
  0xdc   : > { %v464_v14 = vmul.f32 %v462_v8, %v455_v13 }
  0xde   : > { %v466_v15 = vsub.f32 %v451_v1, %v464_v14 }
  0xe0   : > { %v468_v16 = vmul.f32 %v466_v15, %v466_v15 }
  0xe2   : > { %471 = vadd.xlane.f32.xlu1 %v468_v16 }
 0x14d   : > { %v470_v17 = vpop.xlane.xlu1 %469 }
 0x14e   : > { %v473_v18 = vmul.f32 %v470_v17, %v462_v8 }
 0x150   : > { %v475_v19 = vadd.f32 1e-12, %v473_v18 }
 0x152   : > { %2349 = vrsqrt.f32 %v475_v19  ;;  %vm483_vm2 = vweird.f32 %v475_v19 }
 0x155   : > { %v472_v20 = vpop.xlane.xlu1 %471 }
 0x156   : > { %v474_v21 = vmul.f32 %v472_v20, %v462_v8 }
 0x158   : > { %v2350_v22 = vpop.eup %2349  ;;  %v476_v23 = vadd.f32 1e-12, %v474_v21 }
 0x159   : > { %v478_v24 = vmul.f32 %v2350_v22, %v475_v19  ;;  %vm484_vm1 = vweird.f32 %v2350_v22 }
 0x15a   : > { %2351 = vrsqrt.f32 %v476_v23  ;;  %vm485_vm3 = vmor %vm483_vm2, %vm484_vm1  ;;  %vm493_vm5 = vweird.f32 %v476_v23 }
 0x15b   : > { %v479_v25 = vmul.f32 %v2350_v22, %v478_v24 }
 0x15d   : > { %v480_v26 = vmul.f32 0.5, %v479_v25 }
 0x15f   : > { %v481_v28 = vsub.f32 1.5, %v480_v26 }
 0x160   : > { %v2352_v29 = vpop.eup %2351 }
 0x161   : > { %v482_v30 = vmul.f32 %v2350_v22, %v481_v28  ;;  %v488_v31 = vmul.f32 %v2352_v29, %v476_v23  ;;  %vm494_vm4 = vweird.f32 %v2352_v29 }
 0x162   : > { %vm495_vm6 = vmor %vm493_vm5, %vm494_vm4 }
 0x163   : > { %v486_v33 = vsel %vm485_vm3, %v2350_v22, %v482_v30  ;;  %v489_v34 = vmul.f32 %v2352_v29, %v488_v31 }
 0x164   : > { %v497_v35 = vmul.f32 %v486_v33, %v465_v11 }
 0x165   : > { %v490_v37 = vmul.f32 0.5, %v489_v34 }
 0x166   : > { %v500_v38 = vmul.f32 %v499_v32, %v497_v35 }
 0x167   : > { %v491_v39 = vsub.f32 1.5, %v490_v37 }
 0x168   : > { %v503_v40 = vadd.f32 %v502_v36, %v500_v38 }
 0x169   : > { %v492_v41 = vmul.f32 %v2352_v29, %v491_v39 }
 0x16a   : > { %505 = vst [vmem:[#allocation2] sm:$0xff] %v503_v40 }
 0x16b   : > { %v496_v42 = vsel %vm495_vm6, %v2352_v29, %v492_v41 }
 0x16c   : > { %v498_v43 = vmul.f32 %v496_v42, %v466_v15 }
 0x16e   : > { %v501_v44 = vmul.f32 %v499_v32, %v498_v43 }
 0x170   : > { %v504_v45 = vadd.f32 %v502_v36, %v501_v44 }
 0x172   : > { %506 = vst [vmem:[#allocation2 + $0x8] sm:$0xff] %v504_v45 }
 0x173 PF: > { %v2013_v46 = vld [vmem:[%s2772_s28 + $0xa8] sm:$0xf]  ;;  %v2232_v47 = vld [vmem:[%s2772_s28 + $0xb0] sm:$0xf0]  ;;  %v2231_v48 = vld [vmem:[%s2772_s28 + $0xac] sm:$0xf] }
 0x174   : > { %v2014_v49 = vor.u32 %v2232_v47, %v2013_v46  ;;  %v2015_v50 = vld [vmem:[%s2772_s28 + $0xb4] sm:$0xf0]  ;;  %v2001_v51 = vld [vmem:[%s2772_s28 + $0x90] sm:$0xf]  ;;  %v2229_v52 = vld [vmem:[%s2772_s28 + $0x98] sm:$0xf0] }
 0x175   : > { %v2018_v53 = vor.u32 %v2231_v48, %v2015_v50  ;;  %v2228_v54 = vld [vmem:[%s2772_s28 + $0x94] sm:$0xf]  ;;  %v2003_v55 = vld [vmem:[%s2772_s28 + $0x9c] sm:$0xf0]  ;;  %v2002_v56 = vor.u32 %v2229_v52, %v2001_v51  ;;  %v1989_v58 = vld [vmem:[%s2772_s28 + $0x78] sm:$0xf] }
 0x176   : > { %676 = vmatpush.bf16.msra.mxu0 %v2014_v49  ;;  %v2006_v57 = vor.u32 %v2228_v54, %v2003_v55  ;;  %v2226_v59 = vld [vmem:[%s2772_s28 + $0x80] sm:$0xf0]  ;;  %v2225_v60 = vld [vmem:[%s2772_s28 + $0x7c] sm:$0xf]  ;;  %v1991_v61 = vld [vmem:[%s2772_s28 + $0x84] sm:$0xf0] }
 0x177   : > { %690 = vmatpush.bf16.msra.mxu1 %v2018_v53  ;;  %v1990_v62 = vor.u32 %v2226_v59, %v1989_v58  ;;  %v1994_v63 = vor.u32 %v2225_v60, %v1991_v61  ;;  %v1977_v0 = vld [vmem:[%s2772_s28 + $0x60] sm:$0xf]  ;;  %v2223_v1 = vld [vmem:[%s2772_s28 + $0x68] sm:$0xf0]  ;;  %v2222_v2 = vld [vmem:[%s2772_s28 + $0x64] sm:$0xf] }
 0x178   : > { %v1979_v3 = vld [vmem:[%s2772_s28 + $0x6c] sm:$0xf0]  ;;  %v1978_v4 = vor.u32 %v2223_v1, %v1977_v0  ;;  %v1965_v5 = vld [vmem:[%s2772_s28 + $0x48] sm:$0xf]  ;;  %v2233_v7 = vld [vmem:[%s2772_s28 + $0xb8] sm:$0xf0] }
 0x179   : > { %v2021_v6 = vld [vmem:[%s2772_s28 + $0xb0] sm:$0xf]  ;;  %v1982_v8 = vor.u32 %v2222_v2, %v1979_v3  ;;  %v2220_v9 = vld [vmem:[%s2772_s28 + $0x50] sm:$0xf0]  ;;  %v2009_v11 = vld [vmem:[%s2772_s28 + $0x98] sm:$0xf] }
 0x17a   : > { %677 = vmatpush.bf16.msra.mxu0 %v2002_v56  ;;  %v2022_v10 = vor.u32 %v2233_v7, %v2021_v6  ;;  %v2230_v12 = vld [vmem:[%s2772_s28 + $0xa0] sm:$0xf0]  ;;  %v2219_v13 = vld [vmem:[%s2772_s28 + $0x4c] sm:$0xf]  ;;  %v1967_v14 = vld [vmem:[%s2772_s28 + $0x54] sm:$0xf0]  ;;  %v1966_v16 = vor.u32 %v2220_v9, %v1965_v5 }
 0x17b   : > { %691 = vmatpush.bf16.msra.mxu1 %v2006_v57  ;;  %v2010_v15 = vor.u32 %v2230_v12, %v2009_v11  ;;  %v1997_v17 = vld [vmem:[%s2772_s28 + $0x80] sm:$0xf]  ;;  %v2227_v18 = vld [vmem:[%s2772_s28 + $0x88] sm:$0xf0]  ;;  %v1970_v19 = vor.u32 %v2219_v13, %v1967_v14  ;;  %v1953_v20 = vld [vmem:[%s2772_s28 + $0x30] sm:$0xf] }
 0x17c   : > { %704 = vmatpush.bf16.msra.mxu2 %v2022_v10  ;;  %v2217_v21 = vld [vmem:[%s2772_s28 + $0x38] sm:$0xf0]  ;;  %v2216_v22 = vld [vmem:[%s2772_s28 + $0x34] sm:$0xf]  ;;  %v1955_v23 = vld [vmem:[%s2772_s28 + $0x3c] sm:$0xf0]  ;;  %v1998_v24 = vor.u32 %v2227_v18, %v1997_v17 }
 0x17d   : > { %v1954_v25 = vor.u32 %v2217_v21, %v1953_v20  ;;  %v1985_v26 = vld [vmem:[%s2772_s28 + $0x68] sm:$0xf]  ;;  %v2224_v27 = vld [vmem:[%s2772_s28 + $0x70] sm:$0xf0]  ;;  %v1958_v28 = vor.u32 %v2216_v22, %v1955_v23  ;;  %v1941_v29 = vld [vmem:[%s2772_s28 + $0x18] sm:$0xf] }
 0x17e   : > { %678 = vmatpush.bf16.msra.mxu0 %v1990_v62  ;;  %v2214_v30 = vld [vmem:[%s2772_s28 + $0x20] sm:$0xf0]  ;;  %v2213_v31 = vld [vmem:[%s2772_s28 + $0x1c] sm:$0xf]  ;;  %v1943_v32 = vld [vmem:[%s2772_s28 + $0x24] sm:$0xf0]  ;;  %v1986_v33 = vor.u32 %v2224_v27, %v1985_v26 }
 0x17f   : > { %692 = vmatpush.bf16.msra.mxu1 %v1994_v63  ;;  %v1942_v34 = vor.u32 %v2214_v30, %v1941_v29  ;;  %v1973_v35 = vld [vmem:[%s2772_s28 + $0x50] sm:$0xf]  ;;  %v2221_v36 = vld [vmem:[%s2772_s28 + $0x58] sm:$0xf0]  ;;  %v1946_v37 = vor.u32 %v2213_v31, %v1943_v32  ;;  %v1929_v38 = vld [vmem:[%s2772_s28] sm:$0xf] }
 0x180   : > { %705 = vmatpush.bf16.msra.mxu2 %v2010_v15  ;;  %v2211_v39 = vld [vmem:[%s2772_s28 + $0x8] sm:$0xf0]  ;;  %v2210_v40 = vld [vmem:[%s2772_s28 + $0x4] sm:$0xf]  ;;  %v1931_v41 = vld [vmem:[%s2772_s28 + $0xc] sm:$0xf0]  ;;  %v1974_v43 = vor.u32 %v2221_v36, %v1973_v35 }
 0x181   : > { %v2851_v42 = vld [vmem:[#allocation2] sm:$0xff]  ;;  %v1930_v44 = vor.u32 %v2211_v39, %v1929_v38  ;;  %v2853_v45 = vld [vmem:[#allocation2 + $0x8] sm:$0xff]  ;;  %v1961_v46 = vld [vmem:[%s2772_s28 + $0x38] sm:$0xf]  ;;  %v1934_v48 = vor.u32 %v2210_v40, %v1931_v41  ;;  %vm722_vm7 = vcmask 261120   ;;  %s2592_s6 = smov 64  }
 0x182   : > { %679 = vmatpush.bf16.msra.mxu0 %v1978_v4  ;;  %v2218_v47 = vld [vmem:[%s2772_s28 + $0x40] sm:$0xf0]  ;;  %v512_v49 = vpack.c.bf16 %v2853_v45, %v2851_v42  ;;  %v1949_v51 = vld [vmem:[%s2772_s28 + $0x20] sm:$0xf]  ;;  %v2215_v52 = vld [vmem:[%s2772_s28 + $0x28] sm:$0xf0] }
 0x183   : > { %693 = vmatpush.bf16.msra.mxu1 %v1982_v8  ;;  %v1962_v50 = vor.u32 %v2218_v47, %v1961_v46  ;;  %v1950_v53 = vor.u32 %v2215_v52, %v1949_v51  ;;  %v1937_v54 = vld [vmem:[%s2772_s28 + $0x8] sm:$0xf]  ;;  %v2212_v55 = vld [vmem:[%s2772_s28 + $0x10] sm:$0xf0]  ;;  %v2868_v59 = vld [vmem:[%s2795_s18] sm:$0xff]  ;;  %s2593_s28 = smov 96  }
 0x184   : > { %706 = vmatpush.bf16.msra.mxu2 %v1998_v24  ;;  %v1938_v56 = vor.u32 %v2212_v55, %v1937_v54  ;;  %v2864_v57 = vld [vmem:[%s2795_s18 + $0x8] sm:$0xff]  ;;  %v545_v61 = vperm.slane %v2868_v59, 0  ;;  %s2594_s23 = smov 32   ;;  %v2886_v11 = vld [vmem:[%s2795_s18 + $0x10] sm:$0xff]  ;;  %vm759_vm8 = vcmask 1043456   ;;  %vm742_vm9 = vcmask 64512  }
 0x185   : > { %v546_v58 = vperm.slane %v2864_v57, 0  ;;  %v547_v13 = vperm.slane %v2886_v11, 0  ;;  %v718_v26 = vld [vmem:[%s3105_s2] sm:$0x3]  ;;  %vm840_vm10 = vcmask 523520   ;;  %vm902_vm11 = vcmask 785920  }
 0x186   : > { %680 = vmatpush.bf16.msra.mxu0 %v1966_v16  ;;  %v2902_v27 = vperm.slane %v718_v26, 0  ;;  %v2909_v41 = vperm.slane %v718_v26, 1  ;;  %vm964_vm12 = vcmask 1048320   ;;  %p2199_p10 = scmp.ne.s32.totalorder %s2670_s0, 1 }
 0x187   : > { %694 = vmatpush.bf16.msra.mxu1 %v1970_v19  ;;  %s2201_s30 = sld [smem:[#allocation5 + $0x1]] (!%p2199_p10) }
 0x188   : > { %707 = vmatpush.bf16.msra.mxu2 %v1986_v33 }
 0x18a   : > { %681 = vmatpush.bf16.msra.mxu0 %v1954_v25 }
 0x18b   : > { %695 = vmatpush.bf16.msra.mxu1 %v1958_v28 }
 0x18c   : > { %708 = vmatpush.bf16.msra.mxu2 %v1974_v43 }
 0x18e   : > { %682 = vmatpush.bf16.msra.mxu0 %v1942_v34 }
 0x18f   : > { %696 = vmatpush.bf16.msra.mxu1 %v1946_v37 }
 0x190   : > { %709 = vmatpush.bf16.msra.mxu2 %v1962_v50 }
 0x192   : > { %683 = vmatpush.bf16.msra.mxu0 %v1930_v44 }
 0x193   : > { %697 = vmatpush.bf16.msra.mxu1 %v1934_v48 }
 0x194   : > { %710 = vmatpush.bf16.msra.mxu2 %v1950_v53 }
 0x195   : > { %684 = vmatmul.bf16.vlgmr.msra.gmra.mxu0 %v512_v49 }
 0x196   : > { %698 = vmatmul.bf16.vlgmr.msra.gmra.mxu1 %v512_v49 }
 0x198   : > { %711 = vmatpush.bf16.msra.mxu2 %v1938_v56 }
 0x19b   : > { %712 = vmatmul.bf16.vlgmr.msra.gmra.mxu2 %v512_v49 }
 0x212   : > { %v685_v63 = vpop.f32.mrf.mxu0 }
 0x213   : > { %v699_v60 = vpop.f32.mrf.mxu1  ;;  %v686_v1 = vadd.f32 %v685_v63, %v545_v61 }
 0x214   : > { %v700_v62 = vadd.f32 %v699_v60, %v546_v58 }
 0x215   : > { %v720_v4 = vpack.c.bf16 %v686_v1, %v686_v1 }
 0x216   : > { %v721_v0 = vpack.c.bf16 %v700_v62, %v700_v62 }
 0x218   : > { %844 = vrot.lane.b32.xlu2 %v721_v0, %s2592_s6  ;;  %781 = vrot.lane.b32.xlu1 %v721_v0, %s2593_s28  ;;  %v727_v2 = vsel %vm722_vm7, %v721_v0, 0 }
 0x219   : > { %736 = vmatpush.bf16.xpose.msra.mxu3 %v727_v2 }
 0x21a   : > { %v687_v7 = vpop.f32.mrf.mxu0 }
 0x21b   : > { %v701_v3 = vpop.f32.mrf.mxu1  ;;  %v688_v9 = vadd.f32 %v687_v7, %v545_v61 }
 0x21c   : > { %v702_v5 = vadd.f32 %v701_v3, %v546_v58 }
 0x21d   : > { %v967_v10 = vpack.c.bf16 %v688_v9, %v688_v9 }
 0x21e   : > { %v968_v6 = vpack.c.bf16 %v702_v5, %v702_v5  ;;  %v713_v12 = vpop.f32.mrf.mxu2 }
 0x21f   : > { %v714_v14 = vadd.f32 %v713_v12, %v547_v13 }
 0x220   : > { %906 = vrot.lane.b32.xlu2 %v721_v0, %s2594_s23  ;;  %778 = vrot.lane.b32.xlu1 %v720_v4, %s2593_s28  ;;  %v973_v8 = vsel %vm722_vm7, %v968_v6, 0 }
 0x221   : > { %2023 = vmatmul.msk.bf16.vlgmr.msra.gmra.mxu3 %vm722_vm7, %v720_v4  ;;  %982 = vmatpush.bf16.xpose.msrb.mxu1 %v973_v8  ;;  %v2891_v15 = vpack.c.bf16 %v714_v14, %v714_v14 }
 0x223   : > { %v761_v16 = vsel %vm759_vm8, %v2891_v15, 0 }
 0x224   : > { %770 = vmatpush.bf16.msrb.mxu3 %v761_v16 }
 0x226   : > { %v2925_v61 = vpop.f32.mrf.mxu2 }
 0x228   : > { %1025 = vrot.lane.b32.xlu2 %v968_v6, %s2593_s28  ;;  %2031 = vmatmul.msk.bf16.vlgmr.msrb.gmra.mxu1 %vm722_vm7, %v967_v10 }
 0x229   : > { %904 = vrot.lane.b32.xlu1 %v720_v4, %s2594_s23 }
 0x230   : > { %1087 = vrot.lane.b32.xlu2 %v968_v6, %s2592_s6 }
 0x231   : > { %1022 = vrot.lane.b32.xlu1 %v967_v10, %s2593_s28 }
 0x238   : > { %1085 = vrot.lane.b32.xlu2 %v967_v10, %s2592_s6 }
 0x239   : > { %1148 = vrot.lane.b32.xlu1 %v968_v6, %s2594_s23 }
 0x272   : > { %v845_v17 = vpop.permute.xlu2 %844 }
 0x273   : > { %v850_v18 = vsel %vm722_vm7, %v845_v17, 0 }
 0x274   : > { %859 = vmatpush.bf16.xpose.msrb.mxu2 %v850_v18 }
 0x27a   : > { %v907_v19 = vpop.permute.xlu2 %906 }
 0x27b   : > { %v912_v51 = vsel %vm722_vm7, %v907_v19, 0 }
 0x282   : > { %v1026_v20 = vpop.permute.xlu2 %1025 }
 0x283   : > { %v1031_v54 = vsel %vm722_vm7, %v1026_v20, 0 }
 0x28a   : > { %v1088_v21 = vpop.permute.xlu2 %1087  ;;  %v782_v22 = vpop.permute.xlu1 %781 }
 0x28b   : > { %v1093_v23 = vsel %vm722_vm7, %v1088_v21, 0  ;;  %v787_v24 = vsel %vm722_vm7, %v782_v22, 0 }
 0x28c   : > { %796 = vmatpush.bf16.xpose.msra.mxu3 %v787_v24  ;;  %1102 = vmatpush.bf16.xpose.msra.mxu1 %v1093_v23 }
 0x292   : > { %v1086_v25 = vpop.permute.xlu2 %1085  ;;  %v779_v50 = vpop.permute.xlu1 %778 }
 0x293   : > { %2035 = vmatmul.msk.bf16.vlgmr.msra.gmra.mxu1 %vm722_vm7, %v1086_v25 }
 0x29b   : > { %v905_v53 = vpop.permute.xlu1 %904 }
 0x2a3   : > { %v1023_v55 = vpop.permute.xlu1 %1022 }
 0x2a4   : > { %v738_v28 = vpop.f32.mrf.mxu3 }
 0x2a5   : > { %v739_v29 = vadd.f32 %v738_v28, %v2902_v27  ;;  %v984_v30 = vpop.f32.mrf.mxu1 }
 0x2a6   : > { %v985_v3 = vadd.f32 %v984_v30, %v2909_v41 }
 0x2a7   : > { %v743_v31 = vsel %vm742_vm9, %v739_v29, -inf }
 0x2a8   : > { %744 = vmax.xlane.f32.xlu0 %v743_v31  ;;  %v988_v8 = vsel %vm742_vm9, %v985_v3, -inf }
 0x2ab   : > { %v1149_v56 = vpop.permute.xlu1 %1148 }
 0x2ac   : > { %v740_v32 = vpop.f32.mrf.mxu3  ;;  %v1154_v58 = vsel %vm722_vm7, %v1149_v56, 0 }
 0x2ad   : > { %v986_v33 = vpop.f32.mrf.mxu1 }
 0x310   : > { %v1104_v34 = vpop.f32.mrf.mxu1 }
 0x311   : > { %v2912_v43 = vadd.f32 %v1104_v34, %v2909_v41 }
 0x313   : > { %v1108_v44 = vsel %vm742_vm9, %v2912_v43, -inf }
 0x318   : > { %v1106_v35 = vpop.f32.mrf.mxu1 }
 0x31b   : > { %v745_v36 = vpop.xlane.xlu0 %744 }
 0x31c   : > { %v746_v37 = vsub.f32 %v739_v29, %v745_v36 }
 0x31e   : > { %v747_v38 = vmul.f32 1.442695, %v746_v37 }
 0x320   : > { %2353 = vpow2.f32 %v747_v38 }
 0x326   : > { %v2354_v39 = vpop.eup %2353 }
 0x327   : > { %v749_v40 = vsel %vm742_vm9, %v2354_v39, 0.0 }
 0x328   : > { %750 = vadd.xlane.f32.xlu0 %v749_v40 }
 0x33c   : > { %842 = vrot.lane.b32.xlu0 %v720_v4, %s2592_s6 }
 0x344   : > { %1146 = vrot.lane.b32.xlu0 %v967_v10, %s2594_s23 }
 0x36e   : > { %1109 = vmax.xlane.f32.xlu0 %v1108_v44 }
 0x39b   : > { %v751_v46 = vpop.xlane.xlu0 %750 }
 0x39c   : > { %2355 = vrcp.f32 %v751_v46 }
 0x3a2   : > { %v2356_v47 = vpop.eup %2355 }
 0x3a3   : > { %v753_v48 = vmul.f32 %v2356_v47, %v2354_v39 }
 0x3a5   : > { %v754_v49 = vpack.c.bf16 %v753_v48, %v753_v48 }
 0x3a7   : > { %2024 = vmatmul.msk.bf16.vlgmr.msrb.gmra.mxu3 %vm742_vm9, %v754_v49 }
 0x3a8   : > { %921 = vmatpush.bf16.xpose.msrb.mxu3 %v912_v51  ;;  %v716_v51 = vadd.f32 %v2925_v61, %v547_v13 }
 0x3ae   : > { %v843_v52 = vpop.permute.xlu0 %842 }
 0x3af   : > { %2027 = vmatmul.msk.bf16.vlgmr.msrb.gmra.mxu2 %vm722_vm7, %v843_v52 }
 0x3b6   : > { %v1147_v60 = vpop.permute.xlu0 %1146 }
 0x3b7   : > { %2025 = vmatmul.msk.bf16.vlgmr.msra.gmra.mxu3 %vm722_vm7, %v779_v50 }
 0x3b8   : > { %1040 = vmatpush.bf16.xpose.msra.mxu3 %v1031_v54 }
 0x3c7   : > { %2029 = vmatmul.msk.bf16.vlgmr.msrb.gmra.mxu3 %vm722_vm7, %v905_v53  ;;  %v1000_v53 = vpack.c.bf16 %v716_v51, %v716_v51 }
 0x3c8   : > { %1163 = vmatpush.bf16.xpose.msrb.mxu3 %v1154_v58 }
 0x3d7   : > { %2033 = vmatmul.msk.bf16.vlgmr.msra.gmra.mxu3 %vm722_vm7, %v1023_v55 }
 0x3e1   : > { %v1110_v34 = vpop.xlane.xlu0 %1109 }
 0x3e7   : > { %2037 = vmatmul.msk.bf16.vlgmr.msrb.gmra.mxu3 %vm722_vm7, %v1147_v60 }
 0x42a   : > { %v772_v62 = vpop.f32.mrf.mxu3 }
 0x42b   : > { %776 = vst.msk [vmem:[#allocation3] sm:$0xff] %vm722_vm7, %v772_v62 }
 0x432   : > { %v774_v63 = vpop.f32.mrf.mxu3  ;;  %v861_v0 = vpop.f32.mrf.mxu2 }
 0x433   : > { %v862_v1 = vadd.f32 %v861_v0, %v2902_v27 }
 0x435   : > { %v865_v2 = vsel %vm742_vm9, %v862_v1, -inf }
 0x436   : > { %866 = vmax.xlane.f32.xlu2 %v865_v2 }
 0x43a   : > { %v798_v4 = vpop.f32.mrf.mxu3  ;;  %v863_v5 = vpop.f32.mrf.mxu2 }
 0x43b   : > { %v799_v6 = vadd.f32 %v798_v4, %v2902_v27 }
 0x43d   : > { %v802_v7 = vsel %vm742_vm9, %v799_v6, -inf }
 0x43e   : > { %803 = vmax.xlane.f32.xlu1 %v802_v7  ;;  %989 = vmax.xlane.f32.xlu2 %v988_v8 }
 0x442   : > { %v800_v9 = vpop.f32.mrf.mxu3 }
 0x443   : > { %v1005_v9 = vsel %vm759_vm8, %v1000_v53, 0 }
 0x44a   : > { %v923_v10 = vpop.f32.mrf.mxu3 }
 0x44b   : > { %v924_v12 = vadd.f32 %v923_v10, %v2902_v27 }
 0x44d   : > { %v927_v14 = vsel %vm742_vm9, %v924_v12, -inf }
 0x44e   : > { %928 = vmax.xlane.f32.xlu0 %v927_v14 }
 0x452   : > { %v925_v16 = vpop.f32.mrf.mxu3 }
 0x45a   : > { %v1042_v17 = vpop.f32.mrf.mxu3 }
 0x45b   : > { %v1043_v18 = vadd.f32 %v1042_v17, %v2909_v41 }
 0x45d   : > { %v1046_v19 = vsel %vm742_vm9, %v1043_v18, -inf }
 0x45e   : > { %1047 = vmax.xlane.f32.xlu1 %v1046_v19 }
 0x462   : > { %v1044_v20 = vpop.f32.mrf.mxu3  ;;  %815 = vrot.lane.b32.xlu0 %v2891_v15, %s2593_s28 }
 0x46a   : > { %v1165_v21 = vpop.f32.mrf.mxu3 }
 0x46b   : > { %v1166_v35 = vadd.f32 %v1165_v21, %v2909_v41 }
 0x46d   : > { %v1169_v39 = vsel %vm742_vm9, %v1166_v35, -inf }
 0x472   : > { %v1167_v22 = vpop.f32.mrf.mxu3 }
 0x477   : > { %939 = vrot.lane.b32.xlu1 %v2891_v15, %s2594_s23 }
 0x4a9   : > { %v867_v23 = vpop.xlane.xlu2 %866 }
 0x4aa   : > { %v868_v24 = vsub.f32 %v862_v1, %v867_v23 }
 0x4ac   : > { %v869_v25 = vmul.f32 1.442695, %v868_v24 }
 0x4ae   : > { %2357 = vpow2.f32 %v869_v25 }
 0x4b1   : > { %v804_v26 = vpop.xlane.xlu1 %803  ;;  %v990_v27 = vpop.xlane.xlu2 %989 }
 0x4b2   : > { %v805_v28 = vsub.f32 %v799_v6, %v804_v26  ;;  %v991_v29 = vsub.f32 %v985_v3, %v990_v27 }
 0x4b4   : > { %v2358_v30 = vpop.eup %2357  ;;  %v806_v31 = vmul.f32 1.442695, %v805_v28  ;;  %v992_v32 = vmul.f32 1.442695, %v991_v29 }
 0x4b5   : > { %v871_v33 = vsel %vm742_vm9, %v2358_v30, 0.0 }
 0x4b6   : > { %2359 = vpow2.f32 %v806_v31  ;;  %872 = vadd.xlane.f32.xlu2 %v871_v33 }
 0x4b7   : > { %2361 = vpow2.f32 %v992_v32 }
 0x4bc   : > { %v2360_v36 = vpop.eup %2359 }
 0x4bd   : > { %v2944_v37 = vpop.eup %2361  ;;  %v808_v38 = vsel %vm742_vm9, %v2360_v36, 0.0 }
 0x4be   : > { %809 = vadd.xlane.f32.xlu1 %v808_v38  ;;  %v994_v40 = vsel %vm742_vm9, %v2944_v37, 0.0  ;;  %1170 = vmax.xlane.f32.xlu2 %v1169_v39 }
 0x4bf   : > { %995 = vadd.xlane.f32.xlu0 %v994_v40 }
 0x4c1   : > { %v929_v44 = vpop.xlane.xlu0 %928 }
 0x4c2   : > { %v930_v46 = vsub.f32 %v924_v12, %v929_v44 }
 0x4c4   : > { %v931_v47 = vmul.f32 1.442695, %v930_v46 }
 0x4c6   : > { %2363 = vpow2.f32 %v931_v47 }
 0x4cc   : > { %v2364_v48 = vpop.eup %2363 }
 0x4cd   : > { %v933_v41 = vsel %vm742_vm9, %v2364_v48, 0.0 }
 0x4ce   : > { %934 = vadd.xlane.f32.xlu1 %v933_v41 }
 0x4d1   : > { %v1048_v52 = vpop.xlane.xlu1 %1047 }
 0x4d2   : > { %v1049_v56 = vsub.f32 %v1043_v18, %v1048_v52 }
 0x4d4   : > { %v816_v49 = vpop.permute.xlu0 %815  ;;  %v1050_v58 = vmul.f32 1.442695, %v1049_v56 }
 0x4d5   : > { %v821_v50 = vsel %vm759_vm8, %v816_v49, 0 }
 0x4d6   : > { %877 = vrot.lane.b32.xlu2 %v2891_v15, %s2592_s6  ;;  %830 = vmatpush.bf16.msrb.mxu0 %v821_v50  ;;  %2365 = vpow2.f32 %v1050_v58  ;;  %v1111_v15 = vsub.f32 %v2912_v43, %v1110_v34 }
 0x4d8   : > { %v1112_v11 = vmul.f32 1.442695, %v1111_v15 }
 0x4da   : > { %2367 = vpow2.f32 %v1112_v11 }
 0x4dc   : > { %v2366_v60 = vpop.eup %2365 }
 0x4dd   : > { %v1052_v62 = vsel %vm742_vm9, %v2366_v60, 0.0 }
 0x4e0   : > { %v2961_v13 = vpop.eup %2367 }
 0x4e1   : > { %v1114_v61 = vsel %vm742_vm9, %v2961_v13, 0.0 }
 0x4e7   : > { %1059 = vrot.lane.b32.xlu1 %v1000_v53, %s2593_s28 }
 0x4e9   : > { %v940_v54 = vpop.permute.xlu1 %939 }
 0x4ea   : > { %v945_v55 = vsel %vm759_vm8, %v940_v54, 0 }
 0x4eb   : > { %954 = vmatpush.bf16.msra.mxu0 %v945_v55 }
 0x4ff   : > { %1053 = vadd.xlane.f32.xlu2 %v1052_v62 }
 0x511   : > { %1115 = vadd.xlane.f32.xlu1 %v1114_v61  ;;  %v2240_v61 = vld [vmem:[%s2790_s15 + $0x30] sm:$0xff] }
 0x517   : > { %1181 = vrot.lane.b32.xlu2 %v1000_v53, %s2594_s23 }
 0x529   : > { %v873_v63 = vpop.xlane.xlu2 %872 }
 0x52a   : > { %2369 = vrcp.f32 %v873_v63  ;;  %v2239_v63 = vld [vmem:[%s2790_s15 + $0x28] sm:$0xff] }
 0x530   : > { %v2370_v4 = vpop.eup %2369 }
 0x531   : > { %v810_v0 = vpop.xlane.xlu1 %809  ;;  %v1171_v1 = vpop.xlane.xlu2 %1170  ;;  %v875_v5 = vmul.f32 %v2370_v4, %v2358_v30  ;;  %v2236_v4 = vld [vmem:[%s2790_s15 + $0x10] sm:$0xff] }
 0x532   : > { %2371 = vrcp.f32 %v810_v0  ;;  %v1172_v2 = vsub.f32 %v1166_v35, %v1171_v1  ;;  %v996_v16 = vpop.xlane.xlu0 %995  ;;  %v2238_v0 = vld [vmem:[%s2790_s15 + $0x20] sm:$0xff] }
 0x533   : > { %v876_v14 = vpack.c.bf16 %v875_v5, %v875_v5  ;;  %v2234_v5 = vld [vmem:[%s2790_s15] sm:$0xff] }
 0x534   : > { %v1173_v3 = vmul.f32 1.442695, %v1172_v2 }
 0x536   : > { %2373 = vpow2.f32 %v1173_v3  ;;  %v2237_v3 = vld [vmem:[%s2790_s15 + $0x18] sm:$0xff] }
 0x537   : > { %2375 = vrcp.f32 %v996_v16 }
 0x538   : > { %v2372_v43 = vpop.eup %2371 }
 0x539   : > { %v812_v6 = vmul.f32 %v2372_v43, %v2360_v36  ;;  %v878_v7 = vpop.permute.xlu2 %877  ;;  %v2235_v43 = vld [vmem:[%s2790_s15 + $0x8] sm:$0xff] }
 0x53a   : > { %v883_v8 = vsel %vm759_vm8, %v878_v7, 0 }
 0x53b   : > { %892 = vmatpush.bf16.msra.mxu2 %v883_v8  ;;  %v813_v10 = vpack.c.bf16 %v812_v6, %v812_v6 }
 0x53c   : > { %v2374_v12 = vpop.eup %2373 }
 0x53d   : > { %2026 = vmatmul.msk.bf16.vlgmr.msrb.gmra.mxu0 %vm742_vm9, %v813_v10  ;;  %v1175_v17 = vsel %vm742_vm9, %v2374_v12, 0.0  ;;  %v2376_v19 = vpop.eup %2375 }
 0x53e   : > { %1176 = vadd.xlane.f32.xlu0 %v1175_v17  ;;  %2028 = vmatmul.msk.bf16.vlgmr.msra.gmra.mxu2 %vm742_vm9, %v876_v14  ;;  %v998_v21 = vmul.f32 %v2376_v19, %v2944_v37 }
 0x53f   : > { %1014 = vmatpush.bf16.msrb.mxu2 %v1005_v9 }
 0x540   : > { %v999_v24 = vpack.c.bf16 %v998_v21, %v998_v21  ;;  %v2595_v21 = vmov 128.0  }
 0x541   : > { %v935_v18 = vpop.xlane.xlu1 %934 }
 0x542   : > { %2377 = vrcp.f32 %v935_v18 }
 0x548   : > { %v2378_v20 = vpop.eup %2377 }
 0x549   : > { %v937_v22 = vmul.f32 %v2378_v20, %v2364_v48 }
 0x54b   : > { %v938_v23 = vpack.c.bf16 %v937_v22, %v937_v22 }
 0x54d   : > { %2030 = vmatmul.msk.bf16.vlgmr.msra.gmra.mxu0 %vm742_vm9, %v938_v23 }
 0x54e   : > { %2032 = vmatmul.msk.bf16.vlgmr.msrb.gmra.mxu2 %vm742_vm9, %v999_v24 }
 0x552   : > { %1120 = vrot.lane.b32.xlu0 %v1000_v53, %s2592_s6 }
 0x559   : > { %v1060_v25 = vpop.permute.xlu1 %1059 }
 0x55a   : > { %v1065_v26 = vsel %vm759_vm8, %v1060_v25, 0 }
 0x55b   : > { %1074 = vmatpush.bf16.msrb.mxu0 %v1065_v26 }
 0x572   : > { %v1054_v27 = vpop.xlane.xlu2 %1053 }
 0x573   : > { %2379 = vrcp.f32 %v1054_v27 }
 0x579   : > { %v2380_v28 = vpop.eup %2379 }
 0x57a   : > { %v1056_v29 = vmul.f32 %v2380_v28, %v2366_v60  ;;  %v1182_v30 = vpop.permute.xlu2 %1181 }
 0x57b   : > { %v1187_v31 = vsel %vm759_vm8, %v1182_v30, 0 }
 0x57c   : > { %v1057_v32 = vpack.c.bf16 %v1056_v29, %v1056_v29  ;;  %1196 = vmatpush.bf16.msra.mxu0 %v1187_v31 }
 0x57e   : > { %2034 = vmatmul.msk.bf16.vlgmr.msrb.gmra.mxu0 %vm742_vm9, %v1057_v32 }
 0x584   : > { %v1116_v34 = vpop.xlane.xlu1 %1115 }
 0x5b1   : > { %v1177_v33 = vpop.xlane.xlu0 %1176 }
 0x5b2   : > { %2381 = vrcp.f32 %v1177_v33 }
 0x5b3   : > { %2383 = vrcp.f32 %v1116_v34  ;;  %v2129_v34 = vld [vmem:[%s2779_s13 + $0x70] sm:$0xf] }
 0x5b4   : > { %2385 = vrcp.f32 %v2595_v21 }
 0x5b8   : > { %v2382_v35 = vpop.eup %2381 }
 0x5b9   : > { %v1179_v36 = vmul.f32 %v2382_v35, %v2374_v12  ;;  %v2384_v39 = vpop.eup %2383  ;;  %v1226_v12 = vperm.slane %v2868_v59, 2  ;;  %v2257_v35 = vld [vmem:[%s2779_s13 + $0x74] sm:$0xf0] }
 0x5ba   : > { %v832_v37 = vpop.f32.mrf.mxu0  ;;  %v1118_v46 = vmul.f32 %v2384_v39, %v2961_v13  ;;  %v2241_v13 = vld [vmem:[%s2790_s15 + $0x38] sm:$0xff]  ;;  %v2386_v22 = vpop.eup %2385 }
 0x5bb   : > { %v1180_v38 = vpack.c.bf16 %v1179_v36, %v1179_v36  ;;  %837 = vrot.lane.b32.xlu1 %v832_v37, %s2594_s23  ;;  %1275 = vmatpush.bf16.msrb.mxu1 %v2241_v13  ;;  %v1296_v23 = vmul.f32 128.0, %v2386_v22  ;;  %vm1300_vm13 = vweird.f32 %v2386_v22  ;;  %v2256_v36 = vld [vmem:[%s2779_s13 + $0x74] sm:$0xf]  ;;  %v2130_v37 = vor.u32 %v2257_v35, %v2129_v34  ;;  %v2249_v13 = vld [vmem:[%s2779_s13 + $0x34] sm:$0xf0] }
 0x5bc   : > { %v1119_v41 = vpack.c.bf16 %v1118_v46, %v1118_v46  ;;  %v2254_v46 = vld [vmem:[%s2779_s13 + $0x64] sm:$0xf] }
 0x5bd   : > { %2038 = vmatmul.msk.bf16.vlgmr.msra.gmra.mxu0 %vm742_vm9, %v1180_v38  ;;  %v1297_v24 = vsub.f32 1.0, %v1296_v23  ;;  %v2131_v38 = vld [vmem:[%s2779_s13 + $0x78] sm:$0xf0] }
 0x5be   : > { %v2134_v39 = vor.u32 %v2256_v36, %v2131_v38 }
 0x5bf   : > { %1276 = vmatpush.bf16.msrb.mxu1 %v2240_v61  ;;  %v1298_v25 = vmul.f32 %v2386_v22, %v1297_v24  ;;  %v2248_v61 = vld [vmem:[%s2779_s13 + $0x34] sm:$0xf] }
 0x5c0   : > { %1457 = vmatpush.bf16.msra.mxu3 %v2134_v39 }
 0x5c1   : > { %v894_v40 = vpop.f32.mrf.mxu2  ;;  %v1299_v26 = vadd.f32 %v2386_v22, %v1298_v25 }
 0x5c2   : > { %899 = vrot.lane.b32.xlu0 %v894_v40, %s2592_s6  ;;  %v834_v44 = vpop.f32.mrf.mxu0  ;;  %v2121_v40 = vld [vmem:[%s2779_s13 + $0x60] sm:$0xf] }
 0x5c3   : > { %1277 = vmatpush.bf16.msrb.mxu1 %v2239_v63  ;;  %v3004_v27 = vsel %vm1300_vm13, %v2386_v22, %v1299_v26  ;;  %v2255_v44 = vld [vmem:[%s2779_s13 + $0x64] sm:$0xf0] }
 0x5c4   : > { %v1121_v47 = vpop.permute.xlu0 %1120 }
 0x5c5   : > { %v1126_v48 = vsel %vm759_vm8, %v1121_v47, 0  ;;  %v2122_v47 = vor.u32 %v2255_v44, %v2121_v40 }
 0x5c6   : > { %1135 = vmatpush.bf16.msra.mxu2 %v1126_v48  ;;  %v2123_v48 = vld [vmem:[%s2779_s13 + $0x68] sm:$0xf0] }
 0x5c7   : > { %1278 = vmatpush.bf16.msrb.mxu1 %v2238_v0  ;;  %v2099_v0 = vld [vmem:[%s2779_s13 + $0x38] sm:$0xf0] }
 0x5c9   : > { %v896_v49 = vpop.f32.mrf.mxu2  ;;  %2036 = vmatmul.msk.bf16.vlgmr.msra.gmra.mxu2 %vm742_vm9, %v1119_v41  ;;  %v2126_v41 = vor.u32 %v2254_v46, %v2123_v48  ;;  %v1338_v46 = vperm.slane %v2868_v59, 4 }
 0x5ca   : > { %v956_v50 = vpop.f32.mrf.mxu0  ;;  %1443 = vmatpush.bf16.msrb.mxu2 %v2130_v37  ;;  %v2113_v49 = vld [vmem:[%s2779_s13 + $0x50] sm:$0xf] }
 0x5cb   : > { %1279 = vmatpush.bf16.msrb.mxu1 %v2237_v3  ;;  %1458 = vmatpush.bf16.msra.mxu3 %v2126_v41  ;;  %v2247_v3 = vld [vmem:[%s2779_s13 + $0x24] sm:$0xf0] }
 0x5ce   : > { %1444 = vmatpush.bf16.msrb.mxu2 %v2122_v47 }
 0x5cf   : > { %1280 = vmatpush.bf16.msrb.mxu1 %v2236_v4  ;;  %v2246_v4 = vld [vmem:[%s2779_s13 + $0x24] sm:$0xf] }
 0x5d1   : > { %v1016_v51 = vpop.f32.mrf.mxu2 }
 0x5d2   : > { %1020 = vst.msk [vmem:[#allocation3 + $0x8] sm:$0xff] %vm722_vm7, %v1016_v51  ;;  %v958_v52 = vpop.f32.mrf.mxu0  ;;  %v2252_v51 = vld [vmem:[%s2779_s13 + $0x54] sm:$0xf] }
 0x5d3   : > { %1281 = vmatpush.bf16.msrb.mxu1 %v2235_v43 }
 0x5d7   : > { %1282 = vmatpush.bf16.msrb.mxu1 %v2234_v5  ;;  %v2091_v5 = vld [vmem:[%s2779_s13 + $0x28] sm:$0xf0] }
 0x5d9   : > { %v1018_v53 = vpop.f32.mrf.mxu2 }
 0x5da   : > { %v2115_v53 = vld [vmem:[%s2779_s13 + $0x58] sm:$0xf0] }
 0x5fb   : > { %v1076_v54 = vpop.f32.mrf.mxu0 }
 0x5fc   : > { %1081 = vrot.lane.b32.xlu0 %v1076_v54, %s2594_s23  ;;  %v2118_v54 = vor.u32 %v2252_v51, %v2115_v53 }
 0x5fe   : > { %1459 = vmatpush.bf16.msra.mxu3 %v2118_v54  ;;  %v2265_v54 = vld [vmem:[%s2797_s29 + $0x38] sm:$0xff] }
 0x5ff   : > { %1638 = vmatpush.bf16.msrb.mxu0 %v2265_v54 }
 0x603   : > { %v1078_v55 = vpop.f32.mrf.mxu0 }
 0x604   : > { %961 = vrot.lane.b32.xlu0 %v956_v50, %s2593_s28  ;;  %v2253_v50 = vld [vmem:[%s2779_s13 + $0x54] sm:$0xf0]  ;;  %v2105_v55 = vld [vmem:[%s2779_s13 + $0x40] sm:$0xf] }
 0x605   : > { %v2114_v52 = vor.u32 %v2253_v50, %v2113_v49  ;;  %v1341_v50 = vperm.slane %v2868_v59, 5 }
 0x607   : > { %1445 = vmatpush.bf16.msrb.mxu2 %v2114_v52 }
 0x62d   : > { %v838_v56 = vpop.permute.xlu1 %837 }
 0x62e   : > { %841 = vst.msk [vmem:[#allocation3] sm:$0xff] %vm840_vm10, %v838_v56  ;;  %v2251_v56 = vld [vmem:[%s2779_s13 + $0x44] sm:$0xf0] }
 0x634   : > { %v900_v58 = vpop.permute.xlu0 %899 }
 0x635   : > { %903 = vst.msk [vmem:[#allocation3] sm:$0xff] %vm902_vm11, %v900_v58  ;;  %v2250_v58 = vld [vmem:[%s2779_s13 + $0x44] sm:$0xf] }
 0x63a   : > { %v1198_v60 = vpop.f32.mrf.mxu0 }
 0x642   : > { %v1200_v62 = vpop.f32.mrf.mxu0 }
 0x643   : > { %v2107_v62 = vld [vmem:[%s2779_s13 + $0x48] sm:$0xf0] }
 0x64c   : > { %v1137_v15 = vpop.f32.mrf.mxu2 }
 0x64d   : > { %1142 = vrot.lane.b32.xlu2 %v1137_v15, %s2592_s6  ;;  %v2110_v15 = vor.u32 %v2250_v58, %v2107_v62  ;;  %v2263_v58 = vld [vmem:[%s2797_s29 + $0x28] sm:$0xff]  ;;  %v2262_v62 = vld [vmem:[%s2797_s29 + $0x20] sm:$0xff] }
 0x64f   : > { %1460 = vmatpush.bf16.msra.mxu3 %v2110_v15  ;;  %v2270_v15 = vld [vmem:[%s2797_s29 + $0x60] sm:$0xff] }
 0x654   : > { %v1139_v11 = vpop.f32.mrf.mxu2 }
 0x655   : > { %1203 = vrot.lane.b32.xlu2 %v1198_v60, %s2593_s28  ;;  %v2106_v60 = vor.u32 %v2251_v56, %v2105_v55  ;;  %v2097_v11 = vld [vmem:[%s2779_s13 + $0x30] sm:$0xf] }
 0x656   : > { %v2098_v63 = vor.u32 %v2249_v13, %v2097_v11  ;;  %v2264_v55 = vld [vmem:[%s2797_s29 + $0x30] sm:$0xff]  ;;  %v2261_v11 = vld [vmem:[%s2797_s29 + $0x18] sm:$0xff] }
 0x657   : > { %1446 = vmatpush.bf16.msrb.mxu2 %v2106_v60  ;;  %v2272_v56 = vld [vmem:[%s2797_s29 + $0x70] sm:$0xff]  ;;  %1639 = vmatpush.bf16.msrb.mxu0 %v2264_v55  ;;  %v2271_v60 = vld [vmem:[%s2797_s29 + $0x68] sm:$0xff]  ;;  %v2269_v13 = vld [vmem:[%s2797_s29 + $0x58] sm:$0xff] }
 0x65b   : > { %1447 = vmatpush.bf16.msrb.mxu2 %v2098_v63  ;;  %1640 = vmatpush.bf16.msrb.mxu0 %v2263_v58  ;;  %v2268_v63 = vld [vmem:[%s2797_s29 + $0x50] sm:$0xff] }
 0x65f   : > { %1641 = vmatpush.bf16.msrb.mxu0 %v2262_v62 }
 0x663   : > { %1642 = vmatpush.bf16.msrb.mxu0 %v2261_v11 }
 0x66e   : > { %v1082_v1 = vpop.permute.xlu0 %1081 }
 0x66f   : > { %1084 = vst.msk [vmem:[#allocation3 + $0x8] sm:$0xff] %vm840_vm10, %v1082_v1  ;;  %v2102_v1 = vor.u32 %v2248_v61, %v2099_v0  ;;  %v2260_v61 = vld [vmem:[%s2797_s29 + $0x10] sm:$0xff]  ;;  %v2259_v0 = vld [vmem:[%s2797_s29 + $0x8] sm:$0xff] }
 0x670   : > { %1643 = vmatpush.bf16.msrb.mxu0 %v2260_v61 }
 0x671   : > { %1461 = vmatpush.bf16.msra.mxu3 %v2102_v1  ;;  %v2267_v1 = vld [vmem:[%s2797_s29 + $0x48] sm:$0xff] }
 0x674   : > { %1644 = vmatpush.bf16.msrb.mxu0 %v2259_v0 }
 0x676   : > { %v962_v2 = vpop.permute.xlu0 %961 }
 0x677   : > { %965 = vst.msk [vmem:[#allocation3] sm:$0xff] %vm964_vm12, %v962_v2  ;;  %v2089_v2 = vld [vmem:[%s2779_s13 + $0x20] sm:$0xf] }
 0x678   : > { %v2090_v43 = vor.u32 %v2247_v3, %v2089_v2  ;;  %v1361_v2 = vperm.slane %v2868_v59, 1  ;;  %v1362_v3 = vperm.slane %v2864_v57, 1 }
 0x67a   : > { %1448 = vmatpush.bf16.msrb.mxu2 %v2090_v43 }
 0x67e   : > { %v1207_v8 = vld [vmem:[#allocation3] sm:$0xff] }
 0x6a7   : > { %v1143_v6 = vpop.permute.xlu2 %1142 }
 0x6a8   : > { %1145 = vst.msk [vmem:[#allocation3 + $0x8] sm:$0xff] %vm902_vm11, %v1143_v6  ;;  %v2094_v6 = vor.u32 %v2246_v4, %v2091_v5  ;;  %v2258_v5 = vld [vmem:[%s2797_s29] sm:$0xff] }
 0x6a9   : > { %1645 = vmatpush.bf16.msrb.mxu0 %v2258_v5 }
 0x6aa   : > { %1462 = vmatpush.bf16.msra.mxu3 %v2094_v6  ;;  %v2266_v6 = vld [vmem:[%s2797_s29 + $0x40] sm:$0xff] }
 0x6af   : > { %v1204_v7 = vpop.permute.xlu2 %1203 }
 0x6b0   : > { %1206 = vst.msk [vmem:[#allocation3 + $0x8] sm:$0xff] %vm964_vm12, %v1204_v7  ;;  %v2081_v7 = vld [vmem:[%s2779_s13 + $0x10] sm:$0xf] }
 0x6b7   : > { %v1208_v9 = vld [vmem:[#allocation3 + $0x8] sm:$0xff] }
 0x6b8   : > { %v1209_v10 = vpack.c.bf16 %v1208_v9, %v1207_v8  ;;  %v2245_v8 = vld [vmem:[%s2779_s13 + $0x14] sm:$0xf0]  ;;  %v2244_v9 = vld [vmem:[%s2779_s13 + $0x14] sm:$0xf] }
 0x6ba   : > { %1283 = vmatmul.bf16.vlgmr.msrb.gmra.mxu1 %v1209_v10  ;;  %v2082_v10 = vor.u32 %v2245_v8, %v2081_v7 }
 0x6bc   : > { %1449 = vmatpush.bf16.msrb.mxu2 %v2082_v10 }
 0x737   : > { %v1284_v14 = vpop.f32.mrf.mxu1 }
 0x738   : > { %v1285_v16 = vadd.f32 %v1284_v14, %v1226_v12  ;;  %v2073_v14 = vld [vmem:[%s2779_s13] sm:$0xf] }
 0x73a   : > { %v1289_v17 = vadd.f32 %v1285_v16, %v2851_v42  ;;  %v2243_v16 = vld [vmem:[%s2779_s13 + $0x4] sm:$0xf0] }
 0x73b   : > { %v2074_v22 = vor.u32 %v2243_v16, %v2073_v14 }
 0x73c   : > { %1291 = vadd.xlane.f32.xlu1 %v1289_v17 }
 0x73d   : > { %1450 = vmatpush.bf16.msrb.mxu2 %v2074_v22 }
 0x73f   : > { %v1286_v18 = vpop.f32.mrf.mxu1 }
 0x740   : > { %v1287_v19 = vadd.f32 %v1286_v18, %v1226_v12  ;;  %v2083_v12 = vld [vmem:[%s2779_s13 + $0x18] sm:$0xf0] }
 0x741   : > { %v2086_v18 = vor.u32 %v2244_v9, %v2083_v12 }
 0x742   : > { %v1290_v20 = vadd.f32 %v1287_v19, %v2853_v45  ;;  %v2242_v19 = vld [vmem:[%s2779_s13 + $0x4] sm:$0xf] }
 0x743   : > { %1463 = vmatpush.bf16.msra.mxu3 %v2086_v18 }
 0x744   : > { %1293 = vadd.xlane.f32.xlu0 %v1290_v20 }
 0x7af   : > { %v1292_v42 = vpop.xlane.xlu1 %1291 }
 0x7b0   : > { %v1302_v28 = vmul.f32 %v3004_v27, %v1292_v42 }
 0x7b2   : > { %v3007_v29 = vsub.f32 %v1289_v17, %v1302_v28 }
 0x7b4   : > { %v1306_v45 = vmul.f32 %v3007_v29, %v3007_v29 }
 0x7b6   : > { %1308 = vadd.xlane.f32.xlu2 %v1306_v45 }
 0x7b7   : > { %v1294_v30 = vpop.xlane.xlu0 %1293 }
 0x7b8   : > { %v1303_v31 = vmul.f32 %v3004_v27, %v1294_v30 }
 0x7ba   : > { %v3012_v32 = vsub.f32 %v1290_v20, %v1303_v31  ;;  %v2075_v20 = vld [vmem:[%s2779_s13 + $0x8] sm:$0xf0]  ;;  %s1722_s13 = sld [smem:[#allocation5]] (!%p2199_p10) }
 0x7bb   : > { %v2078_v23 = vor.u32 %v2242_v19, %v2075_v20 }
 0x7bc   : > { %v1307_v33 = vmul.f32 %v3012_v32, %v3012_v32 }
 0x7bd   : > { %1464 = vmatpush.bf16.msra.mxu3 %v2078_v23 }
 0x7be   : > { %1310 = vadd.xlane.f32.xlu1 %v1307_v33 }
 0x829   : > { %v1309_v17 = vpop.xlane.xlu2 %1308 }
 0x82a   : > { %v1312_v21 = vmul.f32 %v1309_v17, %v3004_v27 }
 0x82c   : > { %v1314_v24 = vadd.f32 1e-12, %v1312_v21 }
 0x82e   : > { %2387 = vrsqrt.f32 %v1314_v24  ;;  %vm1322_vm15 = vweird.f32 %v1314_v24 }
 0x831   : > { %v1311_v25 = vpop.xlane.xlu1 %1310 }
 0x832   : > { %v1313_v26 = vmul.f32 %v1311_v25, %v3004_v27 }
 0x834   : > { %v2388_v42 = vpop.eup %2387  ;;  %v1315_v28 = vadd.f32 1e-12, %v1313_v26 }
 0x835   : > { %v1317_v45 = vmul.f32 %v2388_v42, %v1314_v24  ;;  %vm1323_vm14 = vweird.f32 %v2388_v42 }
 0x836   : > { %2389 = vrsqrt.f32 %v1315_v28  ;;  %vm1324_vm0 = vmor %vm1322_vm15, %vm1323_vm14  ;;  %vm1332_vm2 = vweird.f32 %v1315_v28 }
 0x837   : > { %v1318_v30 = vmul.f32 %v2388_v42, %v1317_v45 }
 0x839   : > { %v1319_v31 = vmul.f32 0.5, %v1318_v30 }
 0x83b   : > { %v1320_v33 = vsub.f32 1.5, %v1319_v31 }
 0x83c   : > { %v2390_v34 = vpop.eup %2389 }
 0x83d   : > { %v1321_v35 = vmul.f32 %v2388_v42, %v1320_v33  ;;  %v1327_v36 = vmul.f32 %v2390_v34, %v1315_v28  ;;  %vm1333_vm1 = vweird.f32 %v2390_v34 }
 0x83e   : > { %vm1334_vm3 = vmor %vm1332_vm2, %vm1333_vm1 }
 0x83f   : > { %v1328_v37 = vmul.f32 %v2390_v34, %v1327_v36  ;;  %v1325_v38 = vsel %vm1324_vm0, %v2388_v42, %v1321_v35 }
 0x840   : > { %v1336_v44 = vmul.f32 %v1325_v38, %v3007_v29 }
 0x841   : > { %v1329_v39 = vmul.f32 0.5, %v1328_v37 }
 0x842   : > { %v1339_v49 = vmul.f32 %v1338_v46, %v1336_v44 }
 0x843   : > { %v1330_v40 = vsub.f32 1.5, %v1329_v39 }
 0x844   : > { %v3054_v52 = vadd.f32 %v1341_v50, %v1339_v49 }
 0x845   : > { %v1331_v47 = vmul.f32 %v2390_v34, %v1330_v40 }
 0x847   : > { %v1335_v48 = vsel %vm1334_vm3, %v2390_v34, %v1331_v47 }
 0x848   : > { %v1337_v41 = vmul.f32 %v1335_v48, %v3012_v32  ;;  %v2273_v32 = vld [vmem:[%s2797_s29 + $0x78] sm:$0xff] }
 0x849   : > { %1652 = vmatpush.bf16.msra.mxu1 %v2273_v32 }
 0x84a   : > { %v1340_v51 = vmul.f32 %v1338_v46, %v1337_v41 }
 0x84c   : > { %v3056_v29 = vadd.f32 %v1341_v50, %v1340_v51 }
 0x84d   : > { %1653 = vmatpush.bf16.msra.mxu1 %v2272_v56  ;;  %v2403_v56 = vld [vmem:[%s2795_s18] sm:$0xff] }
 0x84e   : > { %v1344_v53 = vpack.c.bf16 %v3056_v29, %v3054_v52  ;;  %v1541_v58 = vperm.slane %v2403_v56, 3 }
 0x850   : > { %1451 = vmatmul.bf16.vlgmr.msrb.gmra.mxu2 %v1344_v53  ;;  %1465 = vmatmul.bf16.vlgmr.msra.gmra.mxu3 %v1344_v53 }
 0x851   : > { %1654 = vmatpush.bf16.msra.mxu1 %v2271_v60 }
 0x855   : > { %1655 = vmatpush.bf16.msra.mxu1 %v2270_v15 }
 0x859   : > { %1656 = vmatpush.bf16.msra.mxu1 %v2269_v13 }
 0x85d   : > { %1657 = vmatpush.bf16.msra.mxu1 %v2268_v63 }
 0x861   : > { %1658 = vmatpush.bf16.msra.mxu1 %v2267_v1 }
 0x865   : > { %1659 = vmatpush.bf16.msra.mxu1 %v2266_v6 }
 0x8d3   : > { %v1452_v4 = vpop.f32.mrf.mxu2  ;;  %v1466_v43 = vpop.f32.mrf.mxu3 }
 0x8d4   : > { %v1453_v7 = vadd.f32 %v1452_v4, %v1361_v2  ;;  %v1467_v8 = vadd.f32 %v1466_v43, %v1362_v3 }
 0x8d6   : > { %v1471_v9 = vmul.f32 %v1453_v7, %v1453_v7  ;;  %v1472_v10 = vmul.f32 %v1467_v8, %v1467_v8 }
 0x8d8   : > { %v1475_v12 = vmul.f32 %v1471_v9, %v1453_v7  ;;  %v1476_v14 = vmul.f32 %v1472_v10, %v1467_v8 }
 0x8da   : > { %v1479_v16 = vmul.f32 0.044715, %v1475_v12  ;;  %v1480_v17 = vmul.f32 0.044715, %v1476_v14 }
 0x8db   : > { %v1454_v18 = vpop.f32.mrf.mxu2  ;;  %v1468_v59 = vpop.f32.mrf.mxu3 }
 0x8dc   : > { %v1483_v19 = vadd.f32 %v1479_v16, %v1453_v7  ;;  %v1484_v57 = vadd.f32 %v1480_v17, %v1467_v8  ;;  %v1455_v20 = vadd.f32 %v1454_v18, %v1361_v2  ;;  %v1469_v21 = vadd.f32 %v1468_v59, %v1362_v3 }
 0x8de   : > { %v1487_v22 = vmul.f32 0.7978846, %v1483_v19  ;;  %v1473_v23 = vmul.f32 %v1455_v20, %v1455_v20  ;;  %v1474_v24 = vmul.f32 %v1469_v21, %v1469_v21  ;;  %v1488_v25 = vmul.f32 0.7978846, %v1484_v57 }
 0x8e0   : > { %v1477_v26 = vmul.f32 %v1473_v23, %v1455_v20  ;;  %v1478_v42 = vmul.f32 %v1474_v24, %v1469_v21  ;;  %2391 = vtanh.f32 %v1487_v22  ;;  %v1708_v23 = vperm.slane %v2403_v56, 6 }
 0x8e1   : > { %2393 = vtanh.f32 %v1488_v25 }
 0x8e2   : > { %v1481_v28 = vmul.f32 0.044715, %v1477_v26  ;;  %v1482_v45 = vmul.f32 0.044715, %v1478_v42  ;;  %v1711_v26 = vperm.slane %v2403_v56, 7 }
 0x8e4   : > { %v1485_v30 = vadd.f32 %v1481_v28, %v1455_v20  ;;  %v1486_v31 = vadd.f32 %v1482_v45, %v1469_v21 }
 0x8e6   : > { %v1489_v33 = vmul.f32 0.7978846, %v1485_v30  ;;  %v1490_v34 = vmul.f32 0.7978846, %v1486_v31  ;;  %v2392_v35 = vpop.eup %2391 }
 0x8e7   : > { %v2394_v36 = vpop.eup %2393  ;;  %v1495_v37 = vadd.f32 1.0, %v2392_v35 }
 0x8e8   : > { %2395 = vtanh.f32 %v1489_v33  ;;  %v1496_v38 = vadd.f32 1.0, %v2394_v36 }
 0x8e9   : > { %2397 = vtanh.f32 %v1490_v34  ;;  %v1499_v44 = vmul.f32 0.5, %v1495_v37 }
 0x8ea   : > { %v1500_v47 = vmul.f32 0.5, %v1496_v38 }
 0x8eb   : > { %v1503_v50 = vmul.f32 %v1499_v44, %v1453_v7 }
 0x8ec   : > { %v1504_v53 = vmul.f32 %v1500_v47, %v1467_v8 }
 0x8ee   : > { %v2396_v39 = vpop.eup %2395 }
 0x8ef   : > { %v2398_v40 = vpop.eup %2397  ;;  %v1497_v46 = vadd.f32 1.0, %v2396_v39 }
 0x8f0   : > { %v1498_v48 = vadd.f32 1.0, %v2398_v40 }
 0x8f1   : > { %v1501_v41 = vmul.f32 0.5, %v1497_v46 }
 0x8f2   : > { %v1502_v49 = vmul.f32 0.5, %v1498_v48 }
 0x8f3   : > { %v1505_v51 = vmul.f32 %v1501_v41, %v1455_v20 }
 0x8f4   : > { %v1506_v54 = vmul.f32 %v1502_v49, %v1469_v21 }
 0x8f5   : > { %v1507_v32 = vpack.c.bf16 %v1505_v51, %v1503_v50 }
 0x8f6   : > { %v1508_v55 = vpack.c.bf16 %v1506_v54, %v1504_v53 }
 0x8f7   : > { %1646 = vmatmul.bf16.vlgmr.msrb.gmra.mxu0 %v1507_v32 }
 0x8f8   : > { %1660 = vmatmul.bf16.vlgmr.msra.gmra.mxu1 %v1508_v55 }
 0x974   : > { %v1647_v60 = vpop.f32.mrf.mxu0 }
 0x975   : > { %v1648_v62 = vadd.f32 %v1647_v60, %v1541_v58  ;;  %v1661_v15 = vpop.f32.mrf.mxu1 }
 0x977   : > { %v1662_v11 = vadd.f32 %v1661_v15, %v1648_v62 }
 0x979   : > { %v1666_v13 = vadd.f32 %v1662_v11, %v3054_v52 }
 0x97b   : > { %1668 = vadd.xlane.f32.xlu0 %v1666_v13 }
 0x97c   : > { %v1649_v61 = vpop.f32.mrf.mxu0 }
 0x97d   : > { %v1650_v63 = vadd.f32 %v1649_v61, %v1541_v58  ;;  %v1663_v0 = vpop.f32.mrf.mxu1 }
 0x97f   : > { %v1664_v1 = vadd.f32 %v1663_v0, %v1650_v63 }
 0x981   : > { %v1667_v2 = vadd.f32 %v1664_v1, %v3056_v29 }
 0x983   : > { %1670 = vadd.xlane.f32.xlu2 %v1667_v2 }
 0x9ee   : > { %v1669_v3 = vpop.xlane.xlu0 %1668 }
 0x9ef   : > { %v1672_v4 = vmul.f32 %v1669_v3, %v3004_v27 }
 0x9f1   : > { %v1674_v43 = vsub.f32 %v1666_v13, %v1672_v4 }
 0x9f3   : > { %v1676_v5 = vmul.f32 %v1674_v43, %v1674_v43 }
 0x9f5   : > { %1678 = vadd.xlane.f32.xlu1 %v1676_v5 }
 0x9f6   : > { %v1671_v6 = vpop.xlane.xlu2 %1670 }
 0x9f7   : > { %v1673_v7 = vmul.f32 %v1671_v6, %v3004_v27 }
 0x9f9   : > { %v1675_v8 = vsub.f32 %v1667_v2, %v1673_v7 }
 0x9fb   : > { %v1677_v9 = vmul.f32 %v1675_v8, %v1675_v8 }
 0x9fd   : > { %1680 = vadd.xlane.f32.xlu0 %v1677_v9 }
 0xa68   : > { %v1679_v52 = vpop.xlane.xlu1 %1678 }
 0xa69   : > { %v1682_v10 = vmul.f32 %v1679_v52, %v3004_v27 }
 0xa6b   : > { %v1684_v12 = vadd.f32 1e-12, %v1682_v10 }
 0xa6d   : > { %2399 = vrsqrt.f32 %v1684_v12  ;;  %vm1692_vm5 = vweird.f32 %v1684_v12 }
 0xa70   : > { %v1681_v14 = vpop.xlane.xlu0 %1680 }
 0xa71   : > { %v1683_v29 = vmul.f32 %v1681_v14, %v3004_v27 }
 0xa73   : > { %v2400_v16 = vpop.eup %2399  ;;  %v1685_v17 = vadd.f32 1e-12, %v1683_v29 }
 0xa74   : > { %v1687_v18 = vmul.f32 %v2400_v16, %v1684_v12  ;;  %vm1693_vm4 = vweird.f32 %v2400_v16 }
 0xa75   : > { %2401 = vrsqrt.f32 %v1685_v17  ;;  %vm1694_vm6 = vmor %vm1692_vm5, %vm1693_vm4  ;;  %vm1702_vm8 = vweird.f32 %v1685_v17 }
 0xa76   : > { %v1688_v59 = vmul.f32 %v2400_v16, %v1687_v18 }
 0xa78   : > { %v1689_v19 = vmul.f32 0.5, %v1688_v59 }
 0xa7a   : > { %v1690_v57 = vsub.f32 1.5, %v1689_v19 }
 0xa7b   : > { %v2402_v20 = vpop.eup %2401 }
 0xa7c   : > { %v1691_v21 = vmul.f32 %v2400_v16, %v1690_v57  ;;  %v1697_v22 = vmul.f32 %v2402_v20, %v1685_v17  ;;  %vm1703_vm7 = vweird.f32 %v2402_v20 }
 0xa7d   : > { %vm1704_vm9 = vmor %vm1702_vm8, %vm1703_vm7 }
 0xa7e   : > { %v1695_v24 = vsel %vm1694_vm6, %v2400_v16, %v1691_v21  ;;  %v1698_v25 = vmul.f32 %v2402_v20, %v1697_v22 }
 0xa7f   : > { %v1706_v42 = vmul.f32 %v1695_v24, %v1674_v43 }
 0xa80   : > { %v1699_v28 = vmul.f32 0.5, %v1698_v25 }
 0xa81   : > { %v1709_v27 = vmul.f32 %v1708_v23, %v1706_v42 }
 0xa82   : > { %v1700_v45 = vsub.f32 1.5, %v1699_v28 }
 0xa83   : > { %v1712_v30 = vadd.f32 %v1711_v26, %v1709_v27 }
 0xa84   : > { %v1701_v31 = vmul.f32 %v2402_v20, %v1700_v45 }
 0xa85   : > { %1714 = vst [vmem:[#allocation2] sm:$0xff] %v1712_v30 }
 0xa86   : > { %v1705_v33 = vsel %vm1704_vm9, %v2402_v20, %v1701_v31 }
 0xa87   : > { %v1707_v34 = vmul.f32 %v1705_v33, %v1675_v8 }
 0xa89   : > { %v1710_v35 = vmul.f32 %v1708_v23, %v1707_v34  ;;  %1719 = sbr.rel (%p2199_p10) target bundleno = 2893 (0xb4d), region = 72 }
 0xa8b   : > { %v1713_v36 = vadd.f32 %v1711_v26, %v1710_v35 }
 0xa8d   : > { %1715 = vst [vmem:[#allocation2 + $0x8] sm:$0xff] %v1713_v36 }
 0xa8e   : > { %v1720_v37 = vlaneseq  ;;  %v1723_v39 = vstv %s1722_s13  ;;  %v1736_v40 = vstv %s2201_s30  ;;  %v2596_v44 = vmov 0.0  }
 0xa8f   : > { %vm1750_vm12 = vcmask 1041408  }
 0xa90   : > { %v1721_v38 = vshrl.u32 %v1720_v37, 7 }
 0xa92   : > { %vm1724_vm10 = vcmp.eq.s32.totalorder %v1721_v38, %v1723_v39  ;;  %vm1737_vm11 = vcmp.eq.s32.totalorder %v1721_v38, %v1736_v40 }
 0xa93   : > { %v2200_v46 = vsel %vm1724_vm10, 1.0, %v2596_v44  ;;  %v2202_v48 = vsel %vm1737_vm11, 1.0, %v2596_v44 }
 0xa94   : > { %v1727_v47 = vmul.f32 %v2200_v46, %v1712_v30  ;;  %v1740_v41 = vmul.f32 %v2202_v48, %v1713_v36 }
 0xa96   : > { %v1728_v49 = vrot.slane %v1727_v47, 4  ;;  %v1741_v50 = vrot.slane %v1740_v41, 4 }
 0xa98   : > { %v1729_v51 = vadd.f32 %v1728_v49, %v1727_v47  ;;  %v1742_v53 = vadd.f32 %v1741_v50, %v1740_v41 }
 0xa9a   : > { %v1730_v54 = vrot.slane %v1729_v51, 2  ;;  %v1743_v32 = vrot.slane %v1742_v53, 2 }
 0xa9c   : > { %v1731_v55 = vadd.f32 %v1730_v54, %v1729_v51  ;;  %v1744_v56 = vadd.f32 %v1743_v32, %v1742_v53 }
 0xa9e   : > { %v1732_v58 = vrot.slane %v1731_v55, 1  ;;  %v1745_v60 = vrot.slane %v1744_v56, 1 }
 0xaa0   : > { %v1733_v62 = vadd.f32 %v1732_v58, %v1731_v55  ;;  %v1746_v15 = vadd.f32 %v1745_v60, %v1744_v56 }
 0xaa2   : > { %1734 = vst [vmem:[#allocation12] sm:$0x1] %v1733_v62 }
 0xaa3   : > { %1747 = vst [vmem:[#allocation12 + $0x1] sm:$0x1] %v1746_v15 }
 0xaaa   : > { %v1748_v11 = vld [vmem:[#allocation12] sm:$0x3] }
 0xaab   : > { %v1749_v13 = vmul.f32 %v1748_v11, %v1748_v11 }
 0xaad   : > { %v1751_v61 = vsel %vm1750_vm12, %v1749_v13, 0.0 }
 0xaae   : > { %1752 = vadd.xlane.f32.xlu0 %v1751_v61 }
 0xb21   : > { %v1753_v63 = vpop.xlane.xlu0 %1752 }
 0xb22   : > { %2404 = vrsqrt.f32 %v1753_v63  ;;  %vm1761_vm13 = vcmp.eq.f32.partialorder %v1753_v63, inf  ;;  %v1764_v6 = vand.u32 2147483648, %v1753_v63  ;;  %vm1763_vm14 = vcmp.eq.f32.partialorder %v1753_v63, 0.0 }
 0xb28   : > { %v2405_v0 = vpop.eup %2404 }
 0xb29   : > { %v1755_v1 = vmul.f32 %v2405_v0, %v1753_v63 }
 0xb2b   : > { %v1756_v2 = vmul.f32 %v2405_v0, %v1755_v1 }
 0xb2d   : > { %v1757_v3 = vmul.f32 0.5, %v1756_v2 }
 0xb2f   : > { %v1758_v4 = vsub.f32 1.5, %v1757_v3 }
 0xb31   : > { %v1759_v43 = vmul.f32 %v2405_v0, %v1758_v4 }
 0xb33   : > { %v1760_v5 = vmul.f32 %v1759_v43, %v1753_v63 }
 0xb35   : > { %v1762_v7 = vsel %vm1761_vm13, %v1753_v63, %v1760_v5 }
 0xb36   : > { %v1765_v8 = vsel %vm1763_vm14, %v1764_v6, %v1762_v7 }
 0xb37   : > { %vm1766_vm15 = vcmp.gt.f32.partialorder %v1765_v8, 1.0 }
 0xb38   : > { %v1767_v9 = vsel %vm1766_vm15, %v1765_v8, 1.0 }
 0xb39   : > { %2406 = vrcp.f32 %v1767_v9  ;;  %v1779_v14 = vand.u32 2147483648, %v1767_v9  ;;  %v1777_v16 = vand.u32 2147483647, %v1767_v9  ;;  %vm1773_vm1 = vweird.f32 %v1767_v9 }
 0xb3b   : > { %v1780_v18 = vor.u32 1.1754944e-38, %v1779_v14  ;;  %vm1778_vm3 = vcmp.eq.f32.partialorder %v1777_v16, 8.507059e+37 }
 0xb3f   : > { %v2407_v52 = vpop.eup %2406 }
 0xb40   : > { %v1769_v10 = vmul.f32 %v2407_v52, %v1767_v9  ;;  %vm1774_vm0 = vweird.f32 %v2407_v52 }
 0xb41   : > { %vm1775_vm2 = vmor %vm1773_vm1, %vm1774_vm0 }
 0xb42   : > { %v1770_v12 = vsub.f32 1.0, %v1769_v10 }
 0xb44   : > { %v1771_v29 = vmul.f32 %v2407_v52, %v1770_v12 }
 0xb46   : > { %v1772_v17 = vadd.f32 %v2407_v52, %v1771_v29 }
 0xb48   : > { %v1776_v59 = vsel %vm1775_vm2, %v2407_v52, %v1772_v17 }
 0xb49   : > { %v1781_v19 = vsel %vm1778_vm3, %v1780_v18, %v1776_v59 }
 0xb4a   : > { %v1782_v57 = vmul.f32 %v1781_v19, %v1748_v11 }
 0xb4c   : > { %1783 = vst [vmem:[#allocation12] sm:$0x3] %v1782_v57 }
 0xb4d PF: > { %p2299_p5 = scmp.eq.s32.totalorder %s2670_s0, 1  ;;  %s2597_s22 = smov [#allocation12]  }
 0xb4e   : > { %s1790_s26 = sshll.u32 %s2597_s22, 4  ;;  %s1792_s17 = sshll.u32 %s3112_s9, 4  ;;  %s1791_s26 = int_to_ptr.vmem [resolvable:$true] %s1790_s26  ;;  %s1793_s17 = int_to_ptr.hbm [resolvable:$true] %s1792_s17 }
 0xb4f   : > { %2285 = dma.vmem_to_hbm [thread:$0]  (%p2299_p5), %s1791_s26, 32, %s1793_s17, [#allocation8]  }
 0xb50   : > { %2565 = dma.done.wait (%p2299_p5), [#allocation8], 32  }
 0xb51   : > { %2567 = vsyncadd (%p2299_p5), [#allocation8], 4294967264 }
 0xb52 PF: > { %s3126_s16 = sld [smem:[#allocation18_spill]]  ;;  %s3129_s13 = smov %s2574_s14 }
 0xb53   : > { %s3127_s10 = sld [smem:[#allocation17_spill]] }
 0xb54   : > { %s3128_s15 = sld [smem:[#allocation19_spill]] }
 0xb58   : > { %p31_p13 = scmp.ge.s32.totalorder %s3126_s16, 4  }
 0xb59   : > { %s3130_s14 = smov %s3127_s10 }
 0xb5a   :  { %33 = sbr.rel (!%p31_p13) target bundleno = 12 (0xc), region = 127 }
 0xb5f   :  { %1806 = vsyncpa [#allocation7], 1 }
 0xb60   :  { %1808 = vsyncpa [#allocation7 + $0x1], 1 }
 0xb61   :  { %1809 = vsyncpa [#allocation10], 1 }
 0xb62   :  { %1811 = vsyncpa [#allocation10 + $0x1], 1 }
 0xb63   :  { %1812 = vsyncpa [#allocation8], 1 }
 0xb64   :  { %1814 = vsyncpa [#allocation8 + $0x1], 1 }

</bundles_post_ra>
